<compile_context>
chip_gen: v7x
topology: tpu7x:2x2x1
jax: 0.10.0
libtpu: 0.0.40
codegen_flags: <defaults>
</compile_context>

<pallas_src>
import functools

import jax
import jax.numpy as jnp
from jax import lax
from jax.experimental import pallas as pl
from jax.experimental.pallas import tpu as pltpu

C = 64            # fixed by nn.Conv2d(64, 64, 3)
KH = KW = 3
KK = KH * KW      # 9 taps
H = W = 5         # the only spatial size for which the residual broadcast add is defined
WC = W * C        # 320 lanes per image row
OH1 = H - KH + 1  # 3 conv1 output rows
OW1 = W - KW + 1  # 3 conv1 output cols


# --------------------------------------------------------------------------- #
# Kernel
# --------------------------------------------------------------------------- #
def _resunit_kernel(x_ref, w1t_ref, b1t_ref, w2_ref, b2_ref, o_ref):
    """x_ref / o_ref : (NB*H, W*C) lane-merged image rows (image-major).
       w1t_ref       : (KH*W*C, OW1*C) = (960, 192) block-Toeplitz conv1 weights.
       b1t_ref       : (1, OW1*C) f32.
       w2_ref        : (KK*C, C) = (576, 64) im2col conv2 weights.
       b2_ref        : (1, C) f32."""
    rows = x_ref.shape[0]
    nb = rows // H
    cd = w1t_ref.dtype                       # matmul input dtype (f32 or bf16)

    x3 = x_ref[...].reshape(nb, H, WC)       # (nb, 5, 320); expand-leading reshape only
    xr = jnp.maximum(x3, 0.0)                # relu(x)

    def img_row(r):
        # Row r of every image as (nb, WC); unit middle dim removed, lanes untouched.
        return xr[:, r:r + 1, :].reshape(nb, WC)

    # ---- conv1(relu(x)) via block-Toeplitz weights over the W axis ----------
    # For output row oh: concat input rows oh..oh+2 along lanes -> (nb, 960),
    # one MXU matmul against the (960, 192) Toeplitz matrix gives all 3 output
    # cols x 64 channels at once (lane order = (ow, cout)).
    w1t = w1t_ref[...]
    f1_rows = []
    for oh in range(OH1):
        rc = jnp.concatenate([img_row(oh + r) for r in range(KH)], axis=-1)  # (nb, 960)
        f1_rows.append(
            jnp.dot(rc.astype(cd), w1t, preferred_element_type=jnp.float32)
            + b1t_ref[...])                                                   # (nb, 192)

    # ---- conv2(relu(f1)): 1x1 output => patch == whole (3,3,C) map ----------
    # Lane order of the concat is (oh, ow, cin), matching w2's packed row order.
    p2 = jnp.concatenate([jnp.maximum(fr, 0.0) for fr in f1_rows], axis=-1)   # (nb, 576)
    f2 = (jnp.dot(p2.astype(cd), w2_ref[...], preferred_element_type=jnp.float32)
          + b2_ref[...])                                                      # (nb, 64)

    # ---- residual: x + f, with f broadcast over H and W (PyTorch broadcast) --
    f_row = jnp.concatenate([f2] * W, axis=-1)                                # (nb, 320)
    y3 = x3 + f_row[:, None, :]                                               # (nb, 5, 320)
    o_ref[...] = y3.reshape(rows, WC)        # collapse-leading reshape; dense store


# --------------------------------------------------------------------------- #
# Host-side packing (run once, outside the forward path)
# --------------------------------------------------------------------------- #
def pack_params(w1, b1, w2, b2, compute_dtype=jnp.float32):
    """Pack PyTorch OIHW weights into the kernel's matmul layouts.

    compute_dtype=jnp.bfloat16 feeds the MXU natively on v5e/v6e/v7x
    (accumulation stays float32)."""
    # conv1 -> block-Toeplitz over the W axis: (KH*W*Cin, OW1*Cout).
    w1_khkwio = jnp.transpose(w1, (2, 3, 1, 0))             # (KH, KW, Cin, Cout)
    w1t = jnp.zeros((KH * W * C, OW1 * C), jnp.float32)
    for kh in range(KH):
        for ow in range(OW1):
            for kw in range(KW):
                w_in = ow + kw                              # input column index
                r0 = (kh * W + w_in) * C
                w1t = w1t.at[r0:r0 + C, ow * C:(ow + 1) * C].set(w1_khkwio[kh, kw])
    b1t = jnp.tile(b1, OW1).reshape(1, OW1 * C)             # lane order (ow, cout)
    # conv2 -> plain im2col matrix: (KH*KW*Cin, Cout), row order (kh, kw, cin).
    w2p = jnp.transpose(w2, (2, 3, 1, 0)).reshape(KK * C, C)
    return (w1t.astype(compute_dtype), b1t.astype(jnp.float32),
            w2p.astype(compute_dtype), b2.reshape(1, C).astype(jnp.float32))


def _default_tile_config():
    """(batch tile NB, vmem_limit_bytes) chosen per TPU generation."""
    try:
        kind = jax.devices()[0].device_kind.lower()
    except Exception:
        kind = ""
    if "v5 lite" in kind or "v5e" in kind or "v5lite" in kind:
        return 128, 64 << 20       # v5e: 16 MiB scoped default, 128 MiB physical
    if "v6" in kind:
        return 512, 96 << 20       # v6e: 128 MiB physical -> big tiles amortize grid steps
    if "v7" in kind or "7x" in kind:
        return 128, 40 << 20       # v7x: only 64 MiB physical -> smaller tile + headroom
    return 128, None               # unknown chip: conservative tile, default VMEM limit


# --------------------------------------------------------------------------- #
# Wrappers
# --------------------------------------------------------------------------- #
def res_unit_nhwc(x_nhwc, packed, *, nb=None, vmem_limit_bytes=None):
    """Core NHWC forward. x_nhwc: (N, 5, 5, 64) float32; packed from pack_params."""
    w1t, b1t, w2p, b2p = packed
    N, h, w, c = x_nhwc.shape
    assert c == C
    assert h == H and w == W, "ResUnit residual add requires 5x5 spatial input"

    d_nb, d_vmem = _default_tile_config()
    nb = d_nb if nb is None else nb
    if vmem_limit_bytes is None:
        vmem_limit_bytes = d_vmem

    # Fixed batch tile: sublane-aligned (multiple of 8) unless it covers the whole batch.
    nb = max(1, min(nb, N))
    if nb != N:
        nb = max(8, (nb // 8) * 8)
        if nb >= N:
            nb = N

    # Lane-merged presentation: (N*H, W*C) rows, image-major.
    x_rows = x_nhwc.reshape(N * H, WC)

    flops = 2 * N * (OH1 * (KH * WC) * (OW1 * C) + (KK * C) * C)
    bytes_accessed = (2 * N * H * WC * 4
                      + 2 * (w1t.size * w1t.dtype.itemsize
                             + w2p.size * w2p.dtype.itemsize))

    y_rows = pl.pallas_call(
        _resunit_kernel,
        out_shape=jax.ShapeDtypeStruct((N * H, WC), jnp.float32),
        grid_spec=pltpu.PrefetchScalarGridSpec(
            num_scalar_prefetch=0,
            grid=(pl.cdiv(N, nb),),
            in_specs=[
                pl.BlockSpec((nb * H, WC), lambda g: (g, 0)),
                pl.BlockSpec(w1t.shape, lambda g: (0, 0)),
                pl.BlockSpec(b1t.shape, lambda g: (0, 0)),
                pl.BlockSpec(w2p.shape, lambda g: (0, 0)),
                pl.BlockSpec(b2p.shape, lambda g: (0, 0)),
            ],
            out_specs=pl.BlockSpec((nb * H, WC), lambda g: (g, 0)),
        ),
        compiler_params=pltpu.CompilerParams(
            dimension_semantics=("parallel",),
            vmem_limit_bytes=vmem_limit_bytes),
        cost_estimate=pl.CostEstimate(
            flops=flops, transcendentals=0, bytes_accessed=bytes_accessed),
    )(x_rows, w1t, b1t, w2p, b2p)

    return y_rows.reshape(N, H, W, C)


def res_unit(x_nchw, packed, *, nb=None, vmem_limit_bytes=None):
    """PyTorch-compatible NCHW interface.  When stacking ResUnits, prefer keeping
    activations NHWC end-to-end and calling res_unit_nhwc directly."""
    x = jnp.transpose(x_nchw, (0, 2, 3, 1))          # NCHW -> NHWC
    y = res_unit_nhwc(x, packed, nb=nb, vmem_limit_bytes=vmem_limit_bytes)
    return jnp.transpose(y, (0, 3, 1, 2))            # NHWC -> NCHW


# --------------------------------------------------------------------------- #
# Pure-JAX reference (matches PyTorch: NCHW, OIHW, VALID conv)
# --------------------------------------------------------------------------- #
def _reference(x_nchw, w1, b1, w2, b2):
    dn = lax.conv_dimension_numbers(x_nchw.shape, w1.shape, ("NCHW", "OIHW", "NCHW"))

    def conv(inp, w, b):
        y = lax.conv_general_dilated(inp, w, (1, 1), "VALID", dimension_numbers=dn)
        return y + b.reshape(1, C, 1, 1)

    f = conv(jnp.maximum(x_nchw, 0.0), w1, b1)
    f = conv(jnp.maximum(f, 0.0), w2, b2)
    return x_nchw + f


if __name__ == "__main__":
    key = jax.random.PRNGKey(0)
    kx, kx2, kw1, kb1, kw2, kb2 = jax.random.split(key, 6)

    # Deterministic PyTorch-style init: U(-bound, bound), bound = 1/sqrt(fan_in).
    fan_in = C * KH * KW
    bound = 1.0 / (fan_in ** 0.5)
    w1 = jax.random.uniform(kw1, (C, C, KH, KW), jnp.float32, -bound, bound)
    b1 = jax.random.uniform(kb1, (C,), jnp.float32, -bound, bound)
    w2 = jax.random.uniform(kw2, (C, C, KH, KW), jnp.float32, -bound, bound)
    b2 = jax.random.uniform(kb2, (C,), jnp.float32, -bound, bound)

    packed_f32 = pack_params(w1, b1, w2, b2)                     # exact path
    packed_bf16 = pack_params(w1, b1, w2, b2, jnp.bfloat16)      # MXU-native path

    # 1) small batch, exact f32 path.
    x = jax.random.normal(kx, (2, C, H, W), jnp.float32)
    y = jax.block_until_ready(jax.jit(res_unit)(x, packed_f32))
    y_ref = jax.block_until_ready(_reference(x, w1, b1, w2, b2))
    assert y.shape == x.shape
    assert jnp.allclose(y, y_ref, atol=1e-4, rtol=1e-4), "f32 mismatch vs reference"

    # 2) multi-block grid with a ragged final tile (nb=4 rounds up to 8, grid=(2,)).
    x2 = jax.random.normal(kx2, (13, C, H, W), jnp.float32)
    y2 = jax.block_until_ready(jax.jit(functools.partial(res_unit, nb=4))(x2, packed_f32))
    y2_ref = jax.block_until_ready(_reference(x2, w1, b1, w2, b2))
    assert jnp.allclose(y2, y2_ref, atol=1e-4, rtol=1e-4), "ragged-tile mismatch"

    # 3) bf16 MXU-input path (f32 accumulation) -- looser tolerance.
    y3 = jax.block_until_ready(jax.jit(res_unit)(x, packed_bf16))
    assert jnp.allclose(y3, y_ref, atol=5e-2, rtol=5e-2), "bf16 mismatch vs reference"

    print("KERNEL_OK")
</pallas_src>

<mosaic_0001>
module attributes {stable_mosaic.version = 11 : i64} {
  func.func @_resunit_kernel(%arg0: i32, %arg1: memref<10x320xf32, #tpu.memory_space<vmem>>, %arg2: memref<960x192xf32, #tpu.memory_space<vmem>>, %arg3: memref<1x192xf32, #tpu.memory_space<vmem>>, %arg4: memref<576x64xf32, #tpu.memory_space<vmem>>, %arg5: memref<1x64xf32, #tpu.memory_space<vmem>>, %arg6: memref<10x320xf32, #tpu.memory_space<vmem>>) attributes {dimension_semantics = [#tpu.dimension_semantics<parallel>], iteration_bounds = array<i64: 1>, scalar_prefetch = 0 : i64, scratch_operands = 0 : i64, tpu.core_type = #tpu.core_type<tc>, window_params = [{transform_indices = @transform_0, window_bounds = array<i64: 10, 320>}, {pipeline_mode = #tpu.pipeline_mode<synchronous>, transform_indices = @transform_1, window_bounds = array<i64: 960, 192>}, {pipeline_mode = #tpu.pipeline_mode<synchronous>, transform_indices = @transform_2, window_bounds = array<i64: 1, 192>}, {pipeline_mode = #tpu.pipeline_mode<synchronous>, transform_indices = @transform_3, window_bounds = array<i64: 576, 64>}, {pipeline_mode = #tpu.pipeline_mode<synchronous>, transform_indices = @transform_4, window_bounds = array<i64: 1, 64>}, {transform_indices = @transform_5, window_bounds = array<i64: 10, 320>}]} {
    %c0 = arith.constant 0 : index
    %c0_0 = arith.constant 0 : index
    %0 = vector.load %arg1[%c0, %c0_0] : memref<10x320xf32, #tpu.memory_space<vmem>>, vector<10x320xf32>
    %1 = vector.shape_cast %0 : vector<10x320xf32> to vector<2x5x320xf32>
    %cst = arith.constant 0.000000e+00 : f32
    %2 = vector.broadcast %cst : f32 to vector<2x5x320xf32>
    %3 = arith.maximumf %1, %2 : vector<2x5x320xf32>
    %c0_1 = arith.constant 0 : index
    %c0_2 = arith.constant 0 : index
    %4 = vector.load %arg2[%c0_1, %c0_2] : memref<960x192xf32, #tpu.memory_space<vmem>>, vector<960x192xf32>
    %5 = vector.extract_strided_slice %3 {offsets = [0, 0, 0], sizes = [2, 1, 320], strides = [1, 1, 1]} : vector<2x5x320xf32> to vector<2x1x320xf32>
    %6 = vector.shape_cast %5 : vector<2x1x320xf32> to vector<2x320xf32>
    %7 = vector.extract_strided_slice %3 {offsets = [0, 1, 0], sizes = [2, 1, 320], strides = [1, 1, 1]} : vector<2x5x320xf32> to vector<2x1x320xf32>
    %8 = vector.shape_cast %7 : vector<2x1x320xf32> to vector<2x320xf32>
    %9 = vector.extract_strided_slice %3 {offsets = [0, 2, 0], sizes = [2, 1, 320], strides = [1, 1, 1]} : vector<2x5x320xf32> to vector<2x1x320xf32>
    %10 = vector.shape_cast %9 : vector<2x1x320xf32> to vector<2x320xf32>
    %11 = tpu.concatenate %6, %8, %10 in 1 : vector<2x320xf32>, vector<2x320xf32>, vector<2x320xf32> -> vector<2x960xf32>
    %cst_3 = arith.constant dense<0.000000e+00> : vector<2x192xf32>
    %12 = tpu.matmul %11, %4, %cst_3 {dimension_numbers = #tpu.dot_dimension_numbers<[1], [0], [0], [1], [0, 0, 1, 1], [], []>} : vector<2x960xf32>, vector<960x192xf32>, vector<2x192xf32> -> vector<2x192xf32>
    %c0_4 = arith.constant 0 : index
    %c0_5 = arith.constant 0 : index
    %13 = vector.load %arg3[%c0_4, %c0_5] : memref<1x192xf32, #tpu.memory_space<vmem>>, vector<1x192xf32>
    %14 = vector.broadcast %13 : vector<1x192xf32> to vector<2x192xf32>
    %15 = arith.addf %12, %14 : vector<2x192xf32>
    %16 = vector.extract_strided_slice %3 {offsets = [0, 1, 0], sizes = [2, 1, 320], strides = [1, 1, 1]} : vector<2x5x320xf32> to vector<2x1x320xf32>
    %17 = vector.shape_cast %16 : vector<2x1x320xf32> to vector<2x320xf32>
    %18 = vector.extract_strided_slice %3 {offsets = [0, 2, 0], sizes = [2, 1, 320], strides = [1, 1, 1]} : vector<2x5x320xf32> to vector<2x1x320xf32>
    %19 = vector.shape_cast %18 : vector<2x1x320xf32> to vector<2x320xf32>
    %20 = vector.extract_strided_slice %3 {offsets = [0, 3, 0], sizes = [2, 1, 320], strides = [1, 1, 1]} : vector<2x5x320xf32> to vector<2x1x320xf32>
    %21 = vector.shape_cast %20 : vector<2x1x320xf32> to vector<2x320xf32>
    %22 = tpu.concatenate %17, %19, %21 in 1 : vector<2x320xf32>, vector<2x320xf32>, vector<2x320xf32> -> vector<2x960xf32>
    %cst_6 = arith.constant dense<0.000000e+00> : vector<2x192xf32>
    %23 = tpu.matmul %22, %4, %cst_6 {dimension_numbers = #tpu.dot_dimension_numbers<[1], [0], [0], [1], [0, 0, 1, 1], [], []>} : vector<2x960xf32>, vector<960x192xf32>, vector<2x192xf32> -> vector<2x192xf32>
    %c0_7 = arith.constant 0 : index
    %c0_8 = arith.constant 0 : index
    %24 = vector.load %arg3[%c0_7, %c0_8] : memref<1x192xf32, #tpu.memory_space<vmem>>, vector<1x192xf32>
    %25 = vector.broadcast %24 : vector<1x192xf32> to vector<2x192xf32>
    %26 = arith.addf %23, %25 : vector<2x192xf32>
    %27 = vector.extract_strided_slice %3 {offsets = [0, 2, 0], sizes = [2, 1, 320], strides = [1, 1, 1]} : vector<2x5x320xf32> to vector<2x1x320xf32>
    %28 = vector.shape_cast %27 : vector<2x1x320xf32> to vector<2x320xf32>
    %29 = vector.extract_strided_slice %3 {offsets = [0, 3, 0], sizes = [2, 1, 320], strides = [1, 1, 1]} : vector<2x5x320xf32> to vector<2x1x320xf32>
    %30 = vector.shape_cast %29 : vector<2x1x320xf32> to vector<2x320xf32>
    %31 = vector.extract_strided_slice %3 {offsets = [0, 4, 0], sizes = [2, 1, 320], strides = [1, 1, 1]} : vector<2x5x320xf32> to vector<2x1x320xf32>
    %32 = vector.shape_cast %31 : vector<2x1x320xf32> to vector<2x320xf32>
    %33 = tpu.concatenate %28, %30, %32 in 1 : vector<2x320xf32>, vector<2x320xf32>, vector<2x320xf32> -> vector<2x960xf32>
    %cst_9 = arith.constant dense<0.000000e+00> : vector<2x192xf32>
    %34 = tpu.matmul %33, %4, %cst_9 {dimension_numbers = #tpu.dot_dimension_numbers<[1], [0], [0], [1], [0, 0, 1, 1], [], []>} : vector<2x960xf32>, vector<960x192xf32>, vector<2x192xf32> -> vector<2x192xf32>
    %c0_10 = arith.constant 0 : index
    %c0_11 = arith.constant 0 : index
    %35 = vector.load %arg3[%c0_10, %c0_11] : memref<1x192xf32, #tpu.memory_space<vmem>>, vector<1x192xf32>
    %36 = vector.broadcast %35 : vector<1x192xf32> to vector<2x192xf32>
    %37 = arith.addf %34, %36 : vector<2x192xf32>
    %cst_12 = arith.constant 0.000000e+00 : f32
    %38 = vector.broadcast %cst_12 : f32 to vector<2x192xf32>
    %39 = arith.maximumf %15, %38 : vector<2x192xf32>
    %cst_13 = arith.constant 0.000000e+00 : f32
    %40 = vector.broadcast %cst_13 : f32 to vector<2x192xf32>
    %41 = arith.maximumf %26, %40 : vector<2x192xf32>
    %cst_14 = arith.constant 0.000000e+00 : f32
    %42 = vector.broadcast %cst_14 : f32 to vector<2x192xf32>
    %43 = arith.maximumf %37, %42 : vector<2x192xf32>
    %44 = tpu.concatenate %39, %41, %43 in 1 : vector<2x192xf32>, vector<2x192xf32>, vector<2x192xf32> -> vector<2x576xf32>
    %c0_15 = arith.constant 0 : index
    %c0_16 = arith.constant 0 : index
    %45 = vector.load %arg4[%c0_15, %c0_16] : memref<576x64xf32, #tpu.memory_space<vmem>>, vector<576x64xf32>
    %cst_17 = arith.constant dense<0.000000e+00> : vector<2x64xf32>
    %46 = tpu.matmul %44, %45, %cst_17 {dimension_numbers = #tpu.dot_dimension_numbers<[1], [0], [0], [1], [0, 0, 1, 1], [], []>} : vector<2x576xf32>, vector<576x64xf32>, vector<2x64xf32> -> vector<2x64xf32>
    %c0_18 = arith.constant 0 : index
    %c0_19 = arith.constant 0 : index
    %47 = vector.load %arg5[%c0_18, %c0_19] : memref<1x64xf32, #tpu.memory_space<vmem>>, vector<1x64xf32>
    %48 = vector.broadcast %47 : vector<1x64xf32> to vector<2x64xf32>
    %49 = arith.addf %46, %48 : vector<2x64xf32>
    %50 = tpu.concatenate %49, %49, %49, %49, %49 in 1 : vector<2x64xf32>, vector<2x64xf32>, vector<2x64xf32>, vector<2x64xf32>, vector<2x64xf32> -> vector<2x320xf32>
    %51 = vector.shape_cast %50 : vector<2x320xf32> to vector<2x1x320xf32>
    %52 = vector.broadcast %51 : vector<2x1x320xf32> to vector<2x5x320xf32>
    %53 = arith.addf %1, %52 : vector<2x5x320xf32>
    %54 = vector.shape_cast %53 : vector<2x5x320xf32> to vector<10x320xf32>
    %c0_20 = arith.constant 0 : index
    %c0_21 = arith.constant 0 : index
    %55 = vector.load %arg6[%c0_20, %c0_21] : memref<10x320xf32, #tpu.memory_space<vmem>>, vector<10x320xf32>
    tpu.vector_store %arg6[%c0_20, %c0_21], %54 {strides = array<i32>} : memref<10x320xf32, #tpu.memory_space<vmem>>, vector<10x320xf32>,
    return
  }
  func.func @transform_0(%arg0: i32) -> (i32, i32) {
    %c0_i32 = arith.constant 0 : i32
    %c0_i32_0 = arith.constant 0 : i32
    return %arg0, %c0_i32 : i32, i32
  }
  func.func @transform_1(%arg0: i32) -> (i32, i32) {
    %c0_i32 = arith.constant 0 : i32
    %c0_i32_0 = arith.constant 0 : i32
    %c0_i32_1 = arith.constant 0 : i32
    return %c0_i32, %c0_i32_0 : i32, i32
  }
  func.func @transform_2(%arg0: i32) -> (i32, i32) {
    %c0_i32 = arith.constant 0 : i32
    %c0_i32_0 = arith.constant 0 : i32
    %c0_i32_1 = arith.constant 0 : i32
    return %c0_i32, %c0_i32_0 : i32, i32
  }
  func.func @transform_3(%arg0: i32) -> (i32, i32) {
    %c0_i32 = arith.constant 0 : i32
    %c0_i32_0 = arith.constant 0 : i32
    %c0_i32_1 = arith.constant 0 : i32
    return %c0_i32, %c0_i32_0 : i32, i32
  }
  func.func @transform_4(%arg0: i32) -> (i32, i32) {
    %c0_i32 = arith.constant 0 : i32
    %c0_i32_0 = arith.constant 0 : i32
    %c0_i32_1 = arith.constant 0 : i32
    return %c0_i32, %c0_i32_0 : i32, i32
  }
  func.func @transform_5(%arg0: i32) -> (i32, i32) {
    %c0_i32 = arith.constant 0 : i32
    %c0_i32_0 = arith.constant 0 : i32
    return %arg0, %c0_i32 : i32, i32
  }
}

</mosaic_0001>

<bundles_post_ra>
// kernel: res_unit.1
= control target key start
LH: loop header
LB: loop body
LE: loop exit
PB: predicated region body
PF: predicated region fallthrough
CT: control target
= control target key end

     0   :  { %v38_v0 = vlaneseq  ;;  %v3012_v4 = vmov 1966171168   ;;  %s3013_s28 = smov 64   ;;  %vm451_vm0 = vcmask 523264   ;;  %vm3015_vm1 = vmmov 0   ;;  %s4889_s1 = inlined_call_operand.vmem [shape: f32[960,192], index: 1, kind: input, shape index: {}]   ;;  %s4890_s0 = inlined_call_operand.vmem [shape: f32[10,320], index: 0, kind: input, shape index: {}]   ;;  %s4891_s3 = inlined_call_operand.vmem [shape: f32[576,64], index: 3, kind: input, shape index: {}]   ;;  %s4892_s2 = inlined_call_operand.vmem [shape: f32[1,192], index: 2, kind: input, shape index: {}]   ;;  %s4893_s4 = inlined_call_operand.vmem [shape: f32[1,64], index: 4, kind: input, shape index: {}]   ;;  %s4894_s5 = inlined_call_operand.vmem [shape: f32[10,320], index: 5, kind: output, shape index: {}]  }
   0x1   :  { %v151_v1 = vld [vmem:[%s4889_s1 + $0x8] sm:$0xff]  ;;  %v153_v2 = vld [vmem:[%s4889_s1 + $0x18] sm:$0xff]  ;;  %v150_v3 = vld [vmem:[%s4889_s1] sm:$0xff]  ;;  %v36_v5 = vunpack.c.l.s4 %v3012_v4  ;;  %vm2055_vm2 = vcmask 517120  }
   0x2   :  { %v3056_v6 = vpack.c.bf16 %v153_v2, %v151_v1  ;;  %v152_v7 = vld [vmem:[%s4889_s1 + $0x10] sm:$0xff]  ;;  %v155_v8 = vld [vmem:[%s4889_s1 + $0x28] sm:$0xff]  ;;  %v157_v9 = vld [vmem:[%s4889_s1 + $0x38] sm:$0xff]  ;;  %v3084_v17 = vshrl.u32 %v38_v0, 7 }
   0x3   :  { %v3067_v10 = vpack.c.bf16 %v152_v7, %v150_v3  ;;  %v3069_v11 = vpack.c.bf16 %v157_v9, %v155_v8  ;;  %v154_v12 = vld [vmem:[%s4889_s1 + $0x20] sm:$0xff]  ;;  %v156_v13 = vld [vmem:[%s4889_s1 + $0x30] sm:$0xff]  ;;  %v159_v14 = vld [vmem:[%s4889_s1 + $0x48] sm:$0xff]  ;;  %v37_v16 = vunpack.c.0.s8 %v36_v5 }
   0x4   :  { %4990 = vst [vmem:[#allocation2_spill] sm:$0xff] %v3056_v6  ;;  %2168 = vmatprep.subr.bf16.mxu1 %v3056_v6  ;;  %v161_v15 = vld [vmem:[%s4889_s1 + $0x58] sm:$0xff]  ;;  %4992 = vst [vmem:[#allocation4_spill] sm:$0xff] %v3084_v17  ;;  %v3087_v18 = vpack.c.bf16 %v156_v13, %v154_v12  ;;  %v158_v20 = vld [vmem:[%s4889_s1 + $0x40] sm:$0xff] }
   0x5   :  { %4991 = vst [vmem:[#allocation3_spill] sm:$0xff] %v3069_v11  ;;  %2170 = vmatpush1.bf16.msra.mxu1 %v3067_v10  ;;  %v3090_v19 = vpack.c.bf16 %v161_v15, %v159_v14  ;;  %v160_v21 = vld [vmem:[%s4889_s1 + $0x50] sm:$0xff]  ;;  %v163_v22 = vld [vmem:[%s4889_s1 + $0x68] sm:$0xff]  ;;  %v165_v23 = vld [vmem:[%s4889_s1 + $0x78] sm:$0xff]  ;;  %v3108_v25 = vsub.s32 %v37_v16, %v3084_v17 }
   0x6   :  { %4993 = vst [vmem:[#allocation5_spill] sm:$0xff] %v3087_v18  ;;  %2172 = vmatprep.subr.bf16.mxu1 %v3069_v11  ;;  %v162_v24 = vld [vmem:[%s4889_s1 + $0x60] sm:$0xff]  ;;  %v3111_v26 = vpack.c.bf16 %v160_v21, %v158_v20  ;;  %v22_v27 = vld [vmem:[%s4890_s0 + $0x10] sm:$0xff]  ;;  %v3117_v28 = vpack.c.bf16 %v165_v23, %v163_v22  ;;  %v167_v34 = vld [vmem:[%s4889_s1 + $0x88] sm:$0xff] }
   0x7   :  { %4994 = vst [vmem:[#allocation6_spill] sm:$0xff] %v3090_v19  ;;  %4995 = vst [vmem:[#allocation7_spill] sm:$0xff] %v3108_v25  ;;  %v164_v29 = vld [vmem:[%s4889_s1 + $0x70] sm:$0xff]  ;;  %v3007_v30 = vld [vmem:[%s4890_s0] ss:$8 sps:$4 sm:$0xff]   ;;  %v34_v32 = vcombine.high %v22_v27, %v22_v27  ;;  %v55_v33 = vrot.slane %v22_v27, %v3108_v25 }
   0x8   :  { %4996 = vst [vmem:[#allocation8_spill] sm:$0xff] %v3111_v26  ;;  %4997 = vst [vmem:[#allocation9_spill] sm:$0xff] %v3117_v28  ;;  %v3009_v31 = vld [vmem:[%s4890_s0 + $0x4] ss:$8 sps:$4 sm:$0xff]   ;;  %v169_v35 = vld [vmem:[%s4889_s1 + $0x98] sm:$0xff]  ;;  %v41_v36 = vrot.slane %v3007_v30, %v3108_v25  ;;  %v3139_v39 = vpack.c.bf16 %v164_v29, %v162_v24 }
   0x9   :  { %2174 = vmatpush1.bf16.msra.mxu1 %v3087_v18  ;;  %v48_v37 = vrot.slane %v3009_v31, %v3108_v25  ;;  %v62_v38 = vrot.slane %v34_v32, %v3108_v25  ;;  %v3142_v40 = vpack.c.bf16 %v169_v35, %v167_v34  ;;  %v166_v41 = vld [vmem:[%s4889_s1 + $0x80] sm:$0xff]  ;;  %v168_v42 = vld [vmem:[%s4889_s1 + $0x90] sm:$0xff]  ;;  %v171_v45 = vld [vmem:[%s4889_s1 + $0xa8] sm:$0xff] }
   0xa   :  { %2176 = vmatprep.subr.bf16.mxu1 %v3090_v19  ;;  %v64_v43 = vcombine.high %v41_v36, %v55_v33  ;;  %v173_v46 = vld [vmem:[%s4889_s1 + $0xb8] sm:$0xff]  ;;  %v63_v47 = vcombine.low %v41_v36, %v55_v33  ;;  %v3163_v51 = vpack.c.bf16 %v168_v42, %v166_v41  ;;  %v170_v55 = vld [vmem:[%s4889_s1 + $0xa0] sm:$0xff]  ;;  %v172_v56 = vld [vmem:[%s4889_s1 + $0xb0] sm:$0xff] }
   0xb   :  { %v65_v44 = vcombine.low %v48_v37, %v62_v38  ;;  %v66_v48 = vcombine.high %v48_v37, %v62_v38  ;;  %v3172_v54 = vpack.c.bf16 %v173_v46, %v171_v45  ;;  %v175_v59 = vld [vmem:[%s4889_s1 + $0xc8] sm:$0xff]  ;;  %v177_v60 = vld [vmem:[%s4889_s1 + $0xd8] sm:$0xff]  ;;  %v3203_v2 = vpack.c.bf16 %v172_v56, %v170_v55  ;;  %v174_v3 = vld [vmem:[%s4889_s1 + $0xc0] sm:$0xff] }
   0xc   :  { %v3160_v50 = vrot.slane %v64_v43, %v3108_v25  ;;  %v3166_v52 = vrot.slane %v63_v47, %v3108_v25  ;;  %v3210_v8 = vpack.c.bf16 %v177_v60, %v175_v59  ;;  %v176_v9 = vld [vmem:[%s4889_s1 + $0xd0] sm:$0xff]  ;;  %v179_v12 = vld [vmem:[%s4889_s1 + $0xe8] sm:$0xff]  ;;  %v181_v13 = vld [vmem:[%s4889_s1 + $0xf8] sm:$0xff] }
   0xd   :  { %2178 = vmatpush1.bf16.msra.mxu1 %v3111_v26  ;;  %v3157_v49 = vrot.slane %v65_v44, %v3108_v25  ;;  %v3169_v53 = vrot.slane %v66_v48, %v3108_v25  ;;  %v178_v20 = vld [vmem:[%s4889_s1 + $0xe0] sm:$0xff]  ;;  %v180_v21 = vld [vmem:[%s4889_s1 + $0xf0] sm:$0xff]  ;;  %v215_v23 = vld [vmem:[%s4889_s1 + $0x208] sm:$0xff]  ;;  %v3242_v29 = vpack.c.bf16 %v176_v9, %v174_v3  ;;  %v3244_v30 = vpack.c.bf16 %v181_v13, %v179_v12 }
   0xe   :  { %2180 = vmatprep.subr.bf16.mxu1 %v3117_v28  ;;  %4999 = vst [vmem:[#allocation11_spill] sm:$0xff] %v3160_v50  ;;  %5000 = vst [vmem:[#allocation12_spill] sm:$0xff] %v3166_v52  ;;  %v141_v58 = vmax.f32 %v3160_v50, 0.0  ;;  %v140_v61 = vmax.f32 %v3166_v52, 0.0  ;;  %v3195_v63 = vcombine.high %v3166_v52, %v3166_v52  ;;  %v217_v24 = vld [vmem:[%s4889_s1 + $0x218] sm:$0xff]  ;;  %v214_v27 = vld [vmem:[%s4889_s1 + $0x200] sm:$0xff] }
   0xf   :  { %4998 = vst [vmem:[#allocation10_spill] sm:$0xff] %v3157_v49  ;;  %5001 = vst [vmem:[#allocation13_spill] sm:$0xff] %v3169_v53  ;;  %v3182_v57 = vcombine.high %v3157_v49, %v3157_v49  ;;  %v145_v62 = vmax.f32 %v3169_v53, 0.0  ;;  %v3200_v1 = vcombine.high %v3169_v53, %v3169_v53  ;;  %v3248_v32 = vpack.c.bf16 %v217_v24, %v215_v23  ;;  %v216_v33 = vld [vmem:[%s4889_s1 + $0x210] sm:$0xff]  ;;  %v219_v34 = vld [vmem:[%s4889_s1 + $0x228] sm:$0xff] }
  0x10   :  { %5003 = vst [vmem:[#allocation15_spill] sm:$0xff] %v3195_v63  ;;  %v142_v5 = vmax.f32 %v3195_v63, 0.0  ;;  %v221_v35 = vld [vmem:[%s4889_s1 + $0x238] sm:$0xff]  ;;  %v3264_v41 = vpack.c.bf16 %v216_v33, %v214_v27  ;;  %v218_v42 = vld [vmem:[%s4889_s1 + $0x220] sm:$0xff]  ;;  %v220_v43 = vld [vmem:[%s4889_s1 + $0x230] sm:$0xff] }
  0x11   :  { %2182 = vmatpush1.bf16.msra.mxu1 %v3139_v39  ;;  %5002 = vst [vmem:[#allocation14_spill] sm:$0xff] %v3182_v57  ;;  %v146_v0 = vmax.f32 %v3182_v57, 0.0  ;;  %5004 = vst [vmem:[#allocation16_spill] sm:$0xff] %v3200_v1  ;;  %v392_v4 = vcombine.low %v140_v61, %v145_v62  ;;  %v147_v14 = vmax.f32 %v3200_v1, 0.0  ;;  %v223_v44 = vld [vmem:[%s4889_s1 + $0x248] sm:$0xff]  ;;  %v185_v46 = vld [vmem:[%s4889_s1 + $0x118] sm:$0xff]  ;;  %2232 = vmatprep.subr.bf16.mxu0 %v3248_v32 }
  0x12   :  { %2184 = vmatprep.subr.bf16.mxu1 %v3142_v40  ;;  %5005 = vst [vmem:[#allocation17_spill] sm:$0xff] %v3264_v41  ;;  %v183_v45 = vld [vmem:[%s4889_s1 + $0x108] sm:$0xff]  ;;  %v3283_v48 = vpack.c.bf16 %v221_v35, %v219_v34  ;;  %v225_v55 = vld [vmem:[%s4889_s1 + $0x258] sm:$0xff]  ;;  %2234 = vmatpush1.bf16.msra.mxu0 %v3264_v41  ;;  %v3295_v60 = vpack.c.bf16 %v220_v43, %v218_v42  ;;  %v182_v62 = vld [vmem:[%s4889_s1 + $0x100] sm:$0xff] }
  0x13   :  { %v421_v7 = vcombine.low %v141_v58, %v146_v0  ;;  %v3223_v15 = vrot.slane %v392_v4, %v3108_v25  ;;  %v459_v22 = vcombine.low %v142_v5, %v147_v14  ;;  %v3298_v61 = vpack.c.bf16 %v180_v21, %v178_v20  ;;  %v222_v3 = vld [vmem:[%s4889_s1 + $0x240] sm:$0xff]  ;;  %v224_v4 = vld [vmem:[%s4889_s1 + $0x250] sm:$0xff]  ;;  %v227_v13 = vld [vmem:[%s4889_s1 + $0x268] sm:$0xff] }
  0x14   :  { %5006 = vst [vmem:[#allocation18_spill] sm:$0xff] %v3283_v48  ;;  %5007 = vst [vmem:[#allocation19_spill] sm:$0xff] %v3295_v60  ;;  %v3303_v0 = vpack.c.bf16 %v225_v55, %v223_v44  ;;  %v184_v9 = vld [vmem:[%s4889_s1 + $0x110] sm:$0xff]  ;;  %2236 = vmatprep.subr.bf16.mxu0 %v3283_v48  ;;  %v229_v14 = vld [vmem:[%s4889_s1 + $0x278] sm:$0xff]  ;;  %v3343_v23 = vpack.c.bf16 %v224_v4, %v222_v3 }
  0x15   :  { %2186 = vmatpush1.bf16.msra.mxu1 %v3163_v51  ;;  %v428_v16 = vrot.slane %v421_v7, %v3108_v25  ;;  %v400_v31 = vcombine.high %v3223_v15, %v3223_v15  ;;  %v466_v38 = vrot.slane %v459_v22, %v3108_v25  ;;  %v3314_v7 = vpack.c.bf16 %v185_v46, %v183_v45  ;;  %v189_v20 = vld [vmem:[%s4889_s1 + $0x138] sm:$0xff]  ;;  %v186_v27 = vld [vmem:[%s4889_s1 + $0x120] sm:$0xff]  ;;  %v228_v34 = vld [vmem:[%s4889_s1 + $0x270] sm:$0xff] }
  0x16   :  { %2188 = vmatprep.subr.bf16.mxu1 %v3172_v54  ;;  %5008 = vst [vmem:[#allocation20_spill] sm:$0xff] %v3303_v0  ;;  %2238 = vmatpush1.bf16.msra.mxu0 %v3295_v60  ;;  %5011 = vst [vmem:[#allocation23_spill] sm:$0xff] %v3343_v23  ;;  %v3346_v24 = vpack.c.bf16 %v184_v9, %v182_v62  ;;  %v226_v33 = vld [vmem:[%s4889_s1 + $0x260] sm:$0xff]  ;;  %v233_v42 = vld [vmem:[%s4889_s1 + $0x298] sm:$0xff] }
  0x17   :  { %v429_v36 = vcombine.high %v428_v16, %v428_v16  ;;  %v3260_v37 = vrot.slane %v428_v16, %v3108_v25  ;;  %v414_v47 = vrot.slane %v400_v31, %v3108_v25  ;;  %v467_v58 = vcombine.high %v466_v38, %v466_v38  ;;  %v187_v16 = vld [vmem:[%s4889_s1 + $0x128] sm:$0xff]  ;;  %2240 = vmatprep.subr.bf16.mxu0 %v3303_v0  ;;  %v193_v45 = vld [vmem:[%s4889_s1 + $0x158] sm:$0xff]  ;;  %v190_v55 = vld [vmem:[%s4889_s1 + $0x140] sm:$0xff] }
  0x18   :  { %v3292_v59 = vrot.slane %v466_v38, %v3108_v25  ;;  %v3352_v31 = vpack.c.bf16 %v229_v14, %v227_v13  ;;  %v3361_v35 = vpack.c.bf16 %v189_v20, %v187_v16  ;;  %v231_v38 = vld [vmem:[%s4889_s1 + $0x288] sm:$0xff]  ;;  %v3386_v46 = vpack.c.bf16 %v228_v34, %v226_v33  ;;  %v230_v62 = vld [vmem:[%s4889_s1 + $0x280] sm:$0xff]  ;;  %v232_v3 = vld [vmem:[%s4889_s1 + $0x290] sm:$0xff] }
  0x19   :  { %2190 = vmatpush1.bf16.msra.mxu1 %v3203_v2  ;;  %v3289_v56 = vrot.slane %v429_v36, %v3108_v25  ;;  %564 = vmatprep.mubr.f32.mxu1 %v414_v47  ;;  %v3320_v12 = vrot.slane %v467_v58, %v3108_v25  ;;  %v3338_v21 = vcombine.high %v3260_v37, %v3260_v37  ;;  %v188_v36 = vld [vmem:[%s4889_s1 + $0x130] sm:$0xff]  ;;  %v191_v44 = vld [vmem:[%s4889_s1 + $0x148] sm:$0xff]  ;;  %v237_v13 = vld [vmem:[%s4889_s1 + $0x2b8] sm:$0xff] }
  0x1a   :  { %2192 = vmatprep.subr.bf16.mxu1 %v3210_v8  ;;  %5012 = vst [vmem:[#allocation24_spill] sm:$0xff] %v3352_v31  ;;  %v3375_v43 = vcombine.high %v3292_v59, %v3292_v59  ;;  %2242 = vmatpush1.bf16.msra.mxu0 %v3343_v23  ;;  %5014 = vst [vmem:[#allocation26_spill] sm:$0xff] %v3386_v46  ;;  %v3389_v47 = vpack.c.bf16 %v188_v36, %v186_v27  ;;  %v235_v9 = vld [vmem:[%s4889_s1 + $0x2a8] sm:$0xff]  ;;  %v197_v16 = vld [vmem:[%s4889_s1 + $0x178] sm:$0xff] }
  0x1b   :  { %v2992_v5 = vpack.i.bf16 %v3289_v56, %v3260_v37  ;;  %5009 = vst [vmem:[#allocation21_spill] sm:$0xff] %v3320_v12  ;;  %5010 = vst [vmem:[#allocation22_spill] sm:$0xff] %v3338_v21  ;;  %v2997_v22 = vpack.i.bf16 %v3320_v12, %v3292_v59  ;;  %2244 = vmatprep.subr.bf16.mxu0 %v3352_v31  ;;  %v3395_v58 = vpack.c.bf16 %v233_v42, %v231_v38  ;;  %v195_v14 = vld [vmem:[%s4889_s1 + $0x168] sm:$0xff]  ;;  %v194_v27 = vld [vmem:[%s4889_s1 + $0x160] sm:$0xff] }
  0x1c   :  { %5013 = vst [vmem:[#allocation25_spill] sm:$0xff] %v3375_v43  ;;  %v3404_v4 = vpack.c.bf16 %v193_v45, %v191_v44  ;;  %v3424_v20 = vpack.c.bf16 %v232_v3, %v230_v62  ;;  %v3433_v33 = vpack.c.bf16 %v237_v13, %v235_v9  ;;  %v234_v34 = vld [vmem:[%s4889_s1 + $0x2a0] sm:$0xff]  ;;  %v236_v36 = vld [vmem:[%s4889_s1 + $0x2b0] sm:$0xff]  ;;  %v3442_v38 = vpack.c.bf16 %v197_v16, %v195_v14  ;;  %v239_v44 = vld [vmem:[%s4889_s1 + $0x2c8] sm:$0xff] }
  0x1d   :  { %2194 = vmatpush1.bf16.msra.mxu1 %v3242_v29  ;;  %2993 = vrot.lane.b32.xlu0 %v2992_v5, %s3013_s28  ;;  %5015 = vst [vmem:[#allocation27_spill] sm:$0xff] %v3395_v58  ;;  %v192_v5 = vld [vmem:[%s4889_s1 + $0x150] sm:$0xff]  ;;  %v241_v45 = vld [vmem:[%s4889_s1 + $0x2d8] sm:$0xff]  ;;  %v3460_v3 = vpack.c.bf16 %v236_v36, %v234_v34  ;;  %v198_v9 = vld [vmem:[%s4889_s1 + $0x180] sm:$0xff] }
  0x1e   :  { %2196 = vmatprep.subr.bf16.mxu1 %v3244_v30  ;;  %2998 = vrot.lane.b32.xlu1 %v2997_v22, %s3013_s28  ;;  %5016 = vst [vmem:[#allocation28_spill] sm:$0xff] %v3424_v20  ;;  %v3427_v22 = vpack.c.bf16 %v192_v5, %v190_v55  ;;  %5017 = vst [vmem:[#allocation29_spill] sm:$0xff] %v3433_v33  ;;  %v196_v42 = vld [vmem:[%s4889_s1 + $0x170] sm:$0xff]  ;;  %v199_v55 = vld [vmem:[%s4889_s1 + $0x188] sm:$0xff]  ;;  %v3469_v13 = vpack.c.bf16 %v241_v45, %v239_v44 }
  0x1f   :  { %2246 = vmatpush1.bf16.msra.mxu0 %v3386_v46  ;;  %v201_v62 = vld [vmem:[%s4889_s1 + $0x198] sm:$0xff]  ;;  %5018 = vst [vmem:[#allocation30_spill] sm:$0xff] %v3460_v3  ;;  %v3463_v5 = vpack.c.bf16 %v196_v42, %v194_v27  ;;  %v238_v14 = vld [vmem:[%s4889_s1 + $0x2c0] sm:$0xff]  ;;  %v240_v16 = vld [vmem:[%s4889_s1 + $0x2d0] sm:$0xff] }
  0x20   :  { %2248 = vmatprep.subr.bf16.mxu0 %v3395_v58  ;;  %5019 = vst [vmem:[#allocation31_spill] sm:$0xff] %v3469_v13  ;;  %v3478_v27 = vpack.c.bf16 %v201_v62, %v199_v55  ;;  %v200_v34 = vld [vmem:[%s4889_s1 + $0x190] sm:$0xff]  ;;  %v243_v36 = vld [vmem:[%s4889_s1 + $0x2e8] sm:$0xff]  ;;  %v245_v42 = vld [vmem:[%s4889_s1 + $0x2f8] sm:$0xff]  ;;  %v3496_v55 = vpack.c.bf16 %v240_v16, %v238_v14 }
  0x21   :  { %2198 = vmatpush1.bf16.msra.mxu1 %v3298_v61  ;;  %449 = vrot.lane.b32.xlu0 %v3338_v21, %s3013_s28  ;;  %v203_v44 = vld [vmem:[%s4889_s1 + $0x1a8] sm:$0xff]  ;;  %v205_v45 = vld [vmem:[%s4889_s1 + $0x1b8] sm:$0xff]  ;;  %v3499_v62 = vpack.c.bf16 %v200_v34, %v198_v9  ;;  %v202_v1 = vld [vmem:[%s4889_s1 + $0x1a0] sm:$0xff]  ;;  %v3505_v57 = vpack.c.bf16 %v245_v42, %v243_v36 }
  0x22   :  { %2200 = vmatprep.subr.bf16.mxu1 %v3314_v7  ;;  %791 = vrot.lane.b32.xlu1 %v3375_v43, %s3013_s28  ;;  %5020 = vst [vmem:[#allocation32_spill] sm:$0xff] %v3496_v55  ;;  %v242_v63 = vld [vmem:[%s4889_s1 + $0x2e0] sm:$0xff]  ;;  %v244_v14 = vld [vmem:[%s4889_s1 + $0x2f0] sm:$0xff]  ;;  %v3514_v9 = vpack.c.bf16 %v205_v45, %v203_v44  ;;  %v247_v34 = vld [vmem:[%s4889_s1 + $0x308] sm:$0xff] }
  0x23   :  { %2250 = vmatpush1.bf16.msra.mxu0 %v3424_v20  ;;  %5021 = vst [vmem:[#allocation33_spill] sm:$0xff] %v3505_v57  ;;  %v204_v16 = vld [vmem:[%s4889_s1 + $0x1b0] sm:$0xff]  ;;  %v249_v36 = vld [vmem:[%s4889_s1 + $0x318] sm:$0xff]  ;;  %v207_v42 = vld [vmem:[%s4889_s1 + $0x1c8] sm:$0xff]  ;;  %v3532_v45 = vpack.c.bf16 %v244_v14, %v242_v63 }
  0x24   :  { %2252 = vmatprep.subr.bf16.mxu0 %v3433_v33  ;;  %5022 = vst [vmem:[#allocation34_spill] sm:$0xff] %v3514_v9  ;;  %v209_v44 = vld [vmem:[%s4889_s1 + $0x1d8] sm:$0xff]  ;;  %v3535_v53 = vpack.c.bf16 %v204_v16, %v202_v1  ;;  %v206_v52 = vld [vmem:[%s4889_s1 + $0x1c0] sm:$0xff]  ;;  %v3541_v17 = vpack.c.bf16 %v249_v36, %v247_v34  ;;  %v248_v63 = vld [vmem:[%s4889_s1 + $0x310] sm:$0xff] }
  0x25   :  { %2202 = vmatpush1.bf16.msra.mxu1 %v3346_v24  ;;  %5023 = vst [vmem:[#allocation35_spill] sm:$0xff] %v3532_v45  ;;  %v246_v49 = vld [vmem:[%s4889_s1 + $0x300] sm:$0xff]  ;;  %v3550_v1 = vpack.c.bf16 %v209_v44, %v207_v42  ;;  %v208_v14 = vld [vmem:[%s4889_s1 + $0x1d0] sm:$0xff]  ;;  %v251_v16 = vld [vmem:[%s4889_s1 + $0x328] sm:$0xff] }
  0x26   :  { %2204 = vmatprep.subr.bf16.mxu1 %v3361_v35  ;;  %5024 = vst [vmem:[#allocation36_spill] sm:$0xff] %v3535_v53  ;;  %5025 = vst [vmem:[#allocation37_spill] sm:$0xff] %v3541_v17  ;;  %v253_v34 = vld [vmem:[%s4889_s1 + $0x338] sm:$0xff]  ;;  %v211_v36 = vld [vmem:[%s4889_s1 + $0x1e8] sm:$0xff]  ;;  %v3571_v12 = vpack.c.bf16 %v248_v63, %v246_v49  ;;  %v3574_v43 = vpack.c.bf16 %v208_v14, %v206_v52 }
  0x27   :  { %2254 = vmatpush1.bf16.msra.mxu0 %v3460_v3  ;;  %5026 = vst [vmem:[#allocation38_spill] sm:$0xff] %v3550_v1  ;;  %v213_v42 = vld [vmem:[%s4889_s1 + $0x1f8] sm:$0xff]  ;;  %v210_v44 = vld [vmem:[%s4889_s1 + $0x1e0] sm:$0xff]  ;;  %v212_v21 = vld [vmem:[%s4889_s1 + $0x1f0] sm:$0xff] }
  0x28   :  { %2256 = vmatprep.subr.bf16.mxu0 %v3469_v13  ;;  %5027 = vst [vmem:[#allocation39_spill] sm:$0xff] %v3571_v12  ;;  %v252_v49 = vld [vmem:[%s4889_s1 + $0x330] sm:$0xff]  ;;  %v3589_v52 = vpack.c.bf16 %v213_v42, %v211_v36  ;;  %v255_v63 = vld [vmem:[%s4889_s1 + $0x348] sm:$0xff]  ;;  %v257_v14 = vld [vmem:[%s4889_s1 + $0x358] sm:$0xff] }
  0x29   :  { %2206 = vmatpush1.bf16.msra.mxu1 %v3389_v47  ;;  %v3604_v36 = vpack.c.bf16 %v257_v14, %v255_v63  ;;  %v254_v42 = vld [vmem:[%s4889_s1 + $0x340] sm:$0xff] }
  0x2a   :  { %2208 = vmatprep.subr.bf16.mxu1 %v3404_v4  ;;  %v258_v14 = vld [vmem:[%s4889_s1 + $0x360] sm:$0xff] }
  0x2b   :  { %2258 = vmatpush1.bf16.msra.mxu0 %v3496_v55  ;;  %v250_v55 = vld [vmem:[%s4889_s1 + $0x320] sm:$0xff]  ;;  %5030 = vst [vmem:[#allocation42_spill] sm:$0xff] %v3604_v36 }
  0x2c   :  { %2260 = vmatprep.subr.bf16.mxu0 %v3505_v57  ;;  %v3580_v57 = vpack.c.bf16 %v253_v34, %v251_v16  ;;  %v3598_v16 = vpack.c.bf16 %v252_v49, %v250_v55  ;;  %v3601_v34 = vpack.c.bf16 %v212_v21, %v210_v44  ;;  %v259_v55 = vld [vmem:[%s4889_s1 + $0x368] sm:$0xff]  ;;  %v261_v21 = vld [vmem:[%s4889_s1 + $0x378] sm:$0xff]  ;;  %v3621_v44 = vrot.slane %v3223_v15, %v3108_v25 }
  0x2d   :  { %2210 = vmatpush1.bf16.msra.mxu1 %v3427_v22  ;;  %v3628_v63 = vpack.c.bf16 %v261_v21, %v259_v55  ;;  %v265_v15 = vld [vmem:[%s4889_s1 + $0x398] sm:$0xff]  ;;  %v262_v21 = vld [vmem:[%s4889_s1 + $0x380] sm:$0xff] }
  0x2e   :  { %2212 = vmatprep.subr.bf16.mxu1 %v3442_v38  ;;  %5028 = vst [vmem:[#allocation40_spill] sm:$0xff] %v3580_v57  ;;  %5029 = vst [vmem:[#allocation41_spill] sm:$0xff] %v3598_v16 }
  0x2f   :  { %2262 = vmatpush1.bf16.msra.mxu0 %v3532_v45  ;;  %5032 = vst [vmem:[#allocation44_spill] sm:$0xff] %v3628_v63 }
  0x30   :  { %2264 = vmatprep.subr.bf16.mxu0 %v3541_v17  ;;  %v256_v17 = vld [vmem:[%s4889_s1 + $0x350] sm:$0xff] }
  0x31   :  { %2214 = vmatpush1.bf16.msra.mxu1 %v3463_v5  ;;  %v3624_v49 = vpack.c.bf16 %v256_v17, %v254_v42  ;;  %v263_v17 = vld [vmem:[%s4889_s1 + $0x388] sm:$0xff] }
  0x32   :  { %2216 = vmatprep.subr.bf16.mxu1 %v3478_v27  ;;  %v3649_v55 = vpack.c.bf16 %v265_v15, %v263_v17 }
  0x33   :  { %2266 = vmatpush1.bf16.msra.mxu0 %v3571_v12  ;;  %5031 = vst [vmem:[#allocation43_spill] sm:$0xff] %v3624_v49 }
  0x34   :  { %2268 = vmatprep.subr.bf16.mxu0 %v3580_v57  ;;  %v260_v57 = vld [vmem:[%s4889_s1 + $0x370] sm:$0xff]  ;;  %5034 = vst [vmem:[#allocation46_spill] sm:$0xff] %v3649_v55 }
  0x35   :  { %2218 = vmatpush1.bf16.msra.mxu1 %v3499_v62  ;;  %v3645_v42 = vpack.c.bf16 %v260_v57, %v258_v14  ;;  %v267_v57 = vld [vmem:[%s4889_s1 + $0x3a8] sm:$0xff]  ;;  %v269_v14 = vld [vmem:[%s4889_s1 + $0x3b8] sm:$0xff] }
  0x36   :  { %2220 = vmatprep.subr.bf16.mxu1 %v3514_v9  ;;  %v3670_v15 = vpack.c.bf16 %v269_v14, %v267_v57 }
  0x37   :  { %2270 = vmatpush1.bf16.msra.mxu0 %v3598_v16  ;;  %5033 = vst [vmem:[#allocation45_spill] sm:$0xff] %v3645_v42 }
  0x38   :  { %2272 = vmatprep.subr.bf16.mxu0 %v3604_v36  ;;  %5036 = vst [vmem:[#allocation48_spill] sm:$0xff] %v3670_v15 }
  0x39   :  { %2222 = vmatpush1.bf16.msra.mxu1 %v3535_v53 }
  0x3a   :  { %2224 = vmatprep.subr.bf16.mxu1 %v3550_v1 }
  0x3b   :  { %2274 = vmatpush1.bf16.msra.mxu0 %v3624_v49 }
  0x3c   :  { %2276 = vmatprep.subr.bf16.mxu0 %v3628_v63 }
  0x3d   :  { %2226 = vmatpush1.bf16.msra.mxu1 %v3574_v43 }
  0x3e   :  { %2228 = vmatprep.subr.bf16.mxu1 %v3589_v52 }
  0x3f   :  { %2278 = vmatpush1.bf16.msra.mxu0 %v3645_v42 }
  0x40   :  { %2280 = vmatprep.subr.bf16.mxu0 %v3649_v55 }
  0x41   :  { %2230 = vmatpush1.bf16.msra.mxu1 %v3601_v34 }
  0x42   :  { %2408 = vmatprep.subr.bf16.mxu1 %v3056_v6  ;;  %v264_v6 = vld [vmem:[%s4889_s1 + $0x390] sm:$0xff] }
  0x43   :  { %v3666_v17 = vpack.c.bf16 %v264_v6, %v262_v21  ;;  %v271_v6 = vld [vmem:[%s4889_s1 + $0x3c8] sm:$0xff]  ;;  %v273_v21 = vld [vmem:[%s4889_s1 + $0x3d8] sm:$0xff] }
  0x44   :  { %565 = vmatmul.mubr.f32.vlgmr.msra.gmra.mrb[0].mxu1 %v3621_v44  ;;  %v3690_v14 = vpack.c.bf16 %v273_v21, %v271_v6 }
  0x45   :  { %2410 = vmatpush1.bf16.msra.mxu1 %v3067_v10  ;;  %893 = vmatprep.mubr.f32.mxu1 %v3289_v56  ;;  %5035 = vst [vmem:[#allocation47_spill] sm:$0xff] %v3666_v17  ;;  %v266_v56 = vld [vmem:[%s4889_s1 + $0x3a0] sm:$0xff] }
  0x46   :  { %2412 = vmatprep.subr.bf16.mxu1 %v3069_v11  ;;  %v268_v11 = vld [vmem:[%s4889_s1 + $0x3b0] sm:$0xff]  ;;  %2282 = vmatpush1.bf16.msra.mxu0 %v3666_v17  ;;  %5038 = vst [vmem:[#allocation50_spill] sm:$0xff] %v3690_v14 }
  0x47   :  { %v3686_v57 = vpack.c.bf16 %v268_v11, %v266_v56  ;;  %2284 = vmatprep.subr.bf16.mxu0 %v3670_v15  ;;  %v275_v11 = vld [vmem:[%s4889_s1 + $0x3e8] sm:$0xff]  ;;  %v277_v56 = vld [vmem:[%s4889_s1 + $0x3f8] sm:$0xff] }
  0x48   :  { %v3710_v21 = vpack.c.bf16 %v277_v56, %v275_v11 }
  0x49   :  { %2414 = vmatpush1.bf16.msra.mxu1 %v3087_v18  ;;  %5037 = vst [vmem:[#allocation49_spill] sm:$0xff] %v3686_v57  ;;  %v272_v18 = vld [vmem:[%s4889_s1 + $0x3d0] sm:$0xff] }
  0x4a   :  { %2416 = vmatprep.subr.bf16.mxu1 %v3090_v19  ;;  %v270_v19 = vld [vmem:[%s4889_s1 + $0x3c0] sm:$0xff]  ;;  %2286 = vmatpush1.bf16.msra.mxu0 %v3686_v57  ;;  %5040 = vst [vmem:[#allocation52_spill] sm:$0xff] %v3710_v21 }
  0x4b   :  { %v3706_v6 = vpack.c.bf16 %v272_v18, %v270_v19  ;;  %2288 = vmatprep.subr.bf16.mxu0 %v3690_v14  ;;  %v279_v18 = vld [vmem:[%s4889_s1 + $0x408] sm:$0xff]  ;;  %v281_v19 = vld [vmem:[%s4889_s1 + $0x418] sm:$0xff] }
  0x4c   :  { %v3730_v56 = vpack.c.bf16 %v281_v19, %v279_v18  ;;  %v3762_v18 = vld.sshfl [vmem:[%s4890_s0 + $0x28] sm:$0x11 pattern:$0x75316420] }
  0x4d   :  { %2418 = vmatpush1.bf16.msra.mxu1 %v3111_v26  ;;  %5039 = vst [vmem:[#allocation51_spill] sm:$0xff] %v3706_v6  ;;  %v276_v26 = vld [vmem:[%s4889_s1 + $0x3f0] sm:$0xff]  ;;  %5044 = vst [vmem:[#allocation56_spill] sm:$0xff] %v3762_v18 }
  0x4e   :  { %2420 = vmatprep.subr.bf16.mxu1 %v3117_v28  ;;  %v274_v28 = vld [vmem:[%s4889_s1 + $0x3e0] sm:$0xff]  ;;  %2290 = vmatpush1.bf16.msra.mxu0 %v3706_v6  ;;  %5042 = vst [vmem:[#allocation54_spill] sm:$0xff] %v3730_v56 }
  0x4f   :  { %v3726_v11 = vpack.c.bf16 %v276_v26, %v274_v28  ;;  %2292 = vmatprep.subr.bf16.mxu0 %v3710_v21  ;;  %v3011_v26 = vld [vmem:[%s4890_s0 + $0x18] ss:$8 sps:$4 sm:$0x33]  }
  0x50   :  { %v3757_v28 = vrot.slane %v3011_v26, %v3108_v25 }
  0x51   :  { %2422 = vmatpush1.bf16.msra.mxu1 %v3139_v39  ;;  %5041 = vst [vmem:[#allocation53_spill] sm:$0xff] %v3726_v11 }
  0x52   :  { %2424 = vmatprep.subr.bf16.mxu1 %v3142_v40  ;;  %2294 = vmatpush1.bf16.msra.mxu0 %v3726_v11  ;;  %5043 = vst [vmem:[#allocation55_spill] sm:$0xff] %v3757_v28  ;;  %v114_v19 = vcombine.low %v3757_v28, %v3762_v18 }
  0x53   :  { %2296 = vmatprep.subr.bf16.mxu0 %v3730_v56 }
  0x55   :  { %2426 = vmatpush1.bf16.msra.mxu1 %v3163_v51 }
  0x56   :  { %2428 = vmatprep.subr.bf16.mxu1 %v3172_v54 }
  0x59   :  { %2430 = vmatpush1.bf16.msra.mxu1 %v3203_v2 }
  0x5a   :  { %2432 = vmatprep.subr.bf16.mxu1 %v3210_v8 }
  0x5d   :  { %2434 = vmatpush1.bf16.msra.mxu1 %v3242_v29 }
  0x5e   :  { %2436 = vmatprep.subr.bf16.mxu1 %v3244_v30 }
  0x61   :  { %2438 = vmatpush1.bf16.msra.mxu1 %v3298_v61 }
  0x62   :  { %2440 = vmatprep.subr.bf16.mxu1 %v3314_v7 }
  0x65   :  { %2442 = vmatpush1.bf16.msra.mxu1 %v3346_v24 }
  0x66   :  { %2444 = vmatprep.subr.bf16.mxu1 %v3361_v35 }
  0x69   :  { %2446 = vmatpush1.bf16.msra.mxu1 %v3389_v47 }
  0x6a   :  { %2448 = vmatprep.subr.bf16.mxu1 %v3404_v4 }
  0x6d   :  { %2450 = vmatpush1.bf16.msra.mxu1 %v3427_v22 }
  0x6e   :  { %2452 = vmatprep.subr.bf16.mxu1 %v3442_v38 }
  0x71   :  { %2454 = vmatpush1.bf16.msra.mxu1 %v3463_v5 }
  0x72   :  { %2456 = vmatprep.subr.bf16.mxu1 %v3478_v27 }
  0x75   :  { %2458 = vmatpush1.bf16.msra.mxu1 %v3499_v62 }
  0x76   :  { %2460 = vmatprep.subr.bf16.mxu1 %v3514_v9 }
  0x79   :  { %2462 = vmatpush1.bf16.msra.mxu1 %v3535_v53  ;;  %v3770_v53 = vcombine.high %v3160_v50, %v3160_v50 }
  0x7a   :  { %2464 = vmatprep.subr.bf16.mxu1 %v3550_v1  ;;  %v3773_v1 = vrot.slane %v114_v19, %v3108_v25 }
  0x7b   :  { %5045 = vst [vmem:[#allocation57_spill] sm:$0xff] %v3770_v53  ;;  %v143_v26 = vmax.f32 %v3770_v53, 0.0 }
  0x7c   :  { %5046 = vst [vmem:[#allocation58_spill] sm:$0xff] %v3773_v1  ;;  %v148_v9 = vmax.f32 %v3773_v1, 0.0 }
  0x7d   :  { %2466 = vmatpush1.bf16.msra.mxu1 %v3574_v43 }
  0x7e   :  { %2468 = vmatprep.subr.bf16.mxu1 %v3589_v52  ;;  %v800_v28 = vcombine.low %v143_v26, %v148_v9  ;;  %v278_v9 = vld [vmem:[%s4889_s1 + $0x400] sm:$0xff]  ;;  %v280_v26 = vld [vmem:[%s4889_s1 + $0x410] sm:$0xff] }
  0x80   :  { %v807_v50 = vrot.slane %v800_v28, %v3108_v25  ;;  %v415_v28 = vcombine.high %v3621_v44, %v3621_v44 }
  0x81   :  { %2470 = vmatpush1.bf16.msra.mxu1 %v3601_v34 }
  0x82   :  { %2472 = vmatprep.subr.bf16.mxu1 %v3248_v32  ;;  %v808_v19 = vcombine.high %v807_v50, %v807_v50  ;;  %v3786_v53 = vrot.slane %v807_v50, %v3108_v25 }
  0x84   :  { %894 = vmatmul.mubr.f32.vlgmr.msra.gmra.mrb[2].mxu1 %v3260_v37  ;;  %v3789_v1 = vrot.slane %v808_v19, %v3108_v25  ;;  %v3801_v50 = vcombine.high %v3786_v53, %v3786_v53  ;;  %v283_v19 = vld [vmem:[%s4889_s1 + $0x428] sm:$0xff] }
  0x85   :  { %2474 = vmatpush1.bf16.msra.mxu1 %v3264_v41  ;;  %v5074_v41 = vld [vmem:[#allocation22_spill] sm:$0xff] }
  0x86   :  { %2476 = vmatprep.subr.bf16.mxu1 %v3283_v48  ;;  %v3002_v37 = vpack.i.bf16 %v3789_v1, %v3786_v53  ;;  %1118 = vrot.lane.b32.xlu1 %v3801_v50, %s3013_s28 }
  0x88   :  { %3003 = vrot.lane.b32.xlu0 %v3002_v37, %s3013_s28  ;;  %v285_v37 = vld [vmem:[%s4889_s1 + $0x438] sm:$0xff] }
  0x89   :  { %2478 = vmatpush1.bf16.msra.mxu1 %v3295_v60 }
  0x8a   :  { %2480 = vmatprep.subr.bf16.mxu1 %v3303_v0 }
  0x8d   :  { %2482 = vmatpush1.bf16.msra.mxu1 %v3343_v23 }
  0x8e   :  { %2484 = vmatprep.subr.bf16.mxu1 %v3352_v31  ;;  %v3824_v31 = vpack.c.bf16 %v285_v37, %v283_v19 }
  0x8f   :  { %v3815_v25 = vpop.permute.xlu0 %2993 }
  0x90   :  { %v4939_v44 = vunpack.i.h.bf16 %v3815_v25  ;;  %v2995_v18 = vunpack.i.l.bf16 %v3815_v25  ;;  %5048 = vst [vmem:[#allocation60_spill] sm:$0xff] %v3824_v31  ;;  %v3826_v23 = vpop.permute.xlu1 %2998 }
  0x91   :  { %2486 = vmatpush1.bf16.msra.mxu1 %v3386_v46  ;;  %v3822_v46 = vpack.c.bf16 %v280_v26, %v278_v9  ;;  %v284_v9 = vld [vmem:[%s4889_s1 + $0x430] sm:$0xff]  ;;  %v4941_v26 = vunpack.i.h.bf16 %v3826_v23  ;;  %v4942_v19 = vunpack.i.l.bf16 %v3826_v23  ;;  %v5073_v48 = vunpack.i.l.bf16 %v3826_v23 }
  0x92   :  { %2488 = vmatprep.subr.bf16.mxu1 %v3395_v58  ;;  %v452_v0 = vsel %vm451_vm0, %v2995_v18, %v4939_v44  ;;  %v485_v60 = vsel %vm451_vm0, %v415_v28, %v2995_v18  ;;  %v282_v58 = vld [vmem:[%s4889_s1 + $0x420] sm:$0xff]  ;;  %v287_v18 = vld [vmem:[%s4889_s1 + $0x448] sm:$0xff]  ;;  %v289_v28 = vld [vmem:[%s4889_s1 + $0x458] sm:$0xff] }
  0x93   :  { %5047 = vst [vmem:[#allocation59_spill] sm:$0xff] %v3822_v46  ;;  %635 = vmatprep.mubr.f32.mxu0 %v452_v0  ;;  %v793_v37 = vsel %vm451_vm0, %v4942_v19, %v4941_v26  ;;  %v3854_v0 = vpack.c.bf16 %v284_v9, %v282_v58  ;;  %v3857_v44 = vpack.c.bf16 %v289_v28, %v287_v18  ;;  %v291_v58 = vld [vmem:[%s4889_s1 + $0x468] sm:$0xff]  ;;  %v293_v9 = vld [vmem:[%s4889_s1 + $0x478] sm:$0xff]  ;;  %v290_v26 = vld [vmem:[%s4889_s1 + $0x460] sm:$0xff] }
  0x94   :  { %636 = vmatmul.mubr.f32.vlgmr.msra.gmra.mrb[0].mxu0 %v485_v60  ;;  %964 = vmatprep.mubr.f32.mxu1 %v793_v37  ;;  %v286_v60 = vld [vmem:[%s4889_s1 + $0x440] sm:$0xff]  ;;  %v3878_v28 = vpack.c.bf16 %v293_v9, %v291_v58  ;;  %v5053_v37 = vld [vmem:[#allocation32_spill] sm:$0xff] }
  0x95   :  { %2490 = vmatpush1.bf16.msra.mxu1 %v3424_v20  ;;  %2298 = vmatpush1.bf16.msra.mxu0 %v3822_v46  ;;  %5049 = vst [vmem:[#allocation61_spill] sm:$0xff] %v3854_v0  ;;  %5050 = vst [vmem:[#allocation62_spill] sm:$0xff] %v3857_v44  ;;  %v292_v19 = vld [vmem:[%s4889_s1 + $0x470] sm:$0xff] }
  0x96   :  { %2492 = vmatprep.subr.bf16.mxu1 %v3433_v33  ;;  %2300 = vmatprep.subr.bf16.mxu0 %v3824_v31  ;;  %v288_v33 = vld [vmem:[%s4889_s1 + $0x450] sm:$0xff]  ;;  %5052 = vst [vmem:[#allocation64_spill] sm:$0xff] %v3878_v28  ;;  %v3895_v58 = vpack.c.bf16 %v292_v19, %v290_v26  ;;  %v299_v26 = vld [vmem:[%s4889_s1 + $0x4a8] sm:$0xff]  ;;  %v301_v19 = vld [vmem:[%s4889_s1 + $0x4b8] sm:$0xff] }
  0x97   :  { %706 = vmatprep.mubr.f32.mxu0 %v3292_v59  ;;  %v3875_v18 = vpack.c.bf16 %v288_v33, %v286_v60  ;;  %v295_v33 = vld [vmem:[%s4889_s1 + $0x488] sm:$0xff]  ;;  %v297_v60 = vld [vmem:[%s4889_s1 + $0x498] sm:$0xff]  ;;  %v5058_v20 = vld [vmem:[#allocation40_spill] sm:$0xff] }
  0x98   :  { %5055 = vst [vmem:[#allocation65_spill] sm:$0xff] %v3895_v58  ;;  %v3898_v9 = vpack.c.bf16 %v297_v60, %v295_v33  ;;  %v3918_v60 = vpack.c.bf16 %v301_v19, %v299_v26 }
  0x99   :  { %2494 = vmatpush1.bf16.msra.mxu1 %v3460_v3  ;;  %2302 = vmatpush1.bf16.msra.mxu0 %v3854_v0  ;;  %5051 = vst [vmem:[#allocation63_spill] sm:$0xff] %v3875_v18  ;;  %v5057_v3 = vld [vmem:[#allocation37_spill] sm:$0xff] }
  0x9a   :  { %2496 = vmatprep.subr.bf16.mxu1 %v3469_v13  ;;  %2304 = vmatprep.subr.bf16.mxu0 %v3857_v44  ;;  %v5054_v13 = vld [vmem:[#allocation33_spill] sm:$0xff]  ;;  %5056 = vst [vmem:[#allocation66_spill] sm:$0xff] %v3898_v9 }
  0x9d   :  { %2498 = vmatpush1.bf16.msra.mxu1 %v5053_v37  ;;  %2306 = vmatpush1.bf16.msra.mxu0 %v3875_v18  ;;  %v296_v37 = vld [vmem:[%s4889_s1 + $0x490] sm:$0xff] }
  0x9e   :  { %2500 = vmatprep.subr.bf16.mxu1 %v5054_v13  ;;  %2308 = vmatprep.subr.bf16.mxu0 %v3878_v28  ;;  %v294_v13 = vld [vmem:[%s4889_s1 + $0x480] sm:$0xff] }
  0x9f   :  { %v3915_v33 = vpack.c.bf16 %v296_v37, %v294_v13  ;;  %v303_v13 = vld [vmem:[%s4889_s1 + $0x4c8] sm:$0xff]  ;;  %v305_v37 = vld [vmem:[%s4889_s1 + $0x4d8] sm:$0xff] }
  0xa0   :  { %v3938_v19 = vpack.c.bf16 %v305_v37, %v303_v13 }
  0xa1   :  { %2502 = vmatpush1.bf16.msra.mxu1 %v3532_v45  ;;  %2310 = vmatpush1.bf16.msra.mxu0 %v3895_v58  ;;  %v300_v45 = vld [vmem:[%s4889_s1 + $0x4b0] sm:$0xff] }
  0xa2   :  { %2504 = vmatprep.subr.bf16.mxu1 %v5057_v3  ;;  %2312 = vmatprep.subr.bf16.mxu0 %v3898_v9  ;;  %v298_v3 = vld [vmem:[%s4889_s1 + $0x4a0] sm:$0xff]  ;;  %5060 = vst [vmem:[#allocation68_spill] sm:$0xff] %v3938_v19 }
  0xa3   :  { %v3935_v26 = vpack.c.bf16 %v300_v45, %v298_v3  ;;  %v307_v3 = vld [vmem:[%s4889_s1 + $0x4e8] sm:$0xff]  ;;  %v309_v45 = vld [vmem:[%s4889_s1 + $0x4f8] sm:$0xff] }
  0xa4   :  { %v3958_v37 = vpack.c.bf16 %v309_v45, %v307_v3 }
  0xa5   :  { %2506 = vmatpush1.bf16.msra.mxu1 %v3571_v12  ;;  %2314 = vmatpush1.bf16.msra.mxu0 %v3915_v33  ;;  %5059 = vst [vmem:[#allocation67_spill] sm:$0xff] %v3935_v26  ;;  %v304_v12 = vld [vmem:[%s4889_s1 + $0x4d0] sm:$0xff] }
  0xa6   :  { %2508 = vmatprep.subr.bf16.mxu1 %v5058_v20  ;;  %2316 = vmatprep.subr.bf16.mxu0 %v3918_v60  ;;  %v302_v20 = vld [vmem:[%s4889_s1 + $0x4c0] sm:$0xff]  ;;  %5062 = vst [vmem:[#allocation70_spill] sm:$0xff] %v3958_v37 }
  0xa7   :  { %v3955_v13 = vpack.c.bf16 %v304_v12, %v302_v20  ;;  %v311_v12 = vld [vmem:[%s4889_s1 + $0x508] sm:$0xff]  ;;  %v313_v20 = vld [vmem:[%s4889_s1 + $0x518] sm:$0xff] }
  0xa8   :  { %v3978_v45 = vpack.c.bf16 %v313_v20, %v311_v12 }
  0xa9   :  { %2510 = vmatpush1.bf16.msra.mxu1 %v3598_v16  ;;  %2318 = vmatpush1.bf16.msra.mxu0 %v3935_v26  ;;  %5061 = vst [vmem:[#allocation69_spill] sm:$0xff] %v3955_v13  ;;  %v308_v16 = vld [vmem:[%s4889_s1 + $0x4f0] sm:$0xff] }
  0xaa   :  { %2512 = vmatprep.subr.bf16.mxu1 %v3604_v36  ;;  %2320 = vmatprep.subr.bf16.mxu0 %v3938_v19  ;;  %v306_v36 = vld [vmem:[%s4889_s1 + $0x4e0] sm:$0xff]  ;;  %5064 = vst [vmem:[#allocation72_spill] sm:$0xff] %v3978_v45 }
  0xab   :  { %v3975_v3 = vpack.c.bf16 %v308_v16, %v306_v36  ;;  %v315_v16 = vld [vmem:[%s4889_s1 + $0x528] sm:$0xff]  ;;  %v317_v36 = vld [vmem:[%s4889_s1 + $0x538] sm:$0xff] }
  0xac   :  { %v3998_v20 = vpack.c.bf16 %v317_v36, %v315_v16 }
  0xad   :  { %2514 = vmatpush1.bf16.msra.mxu1 %v3624_v49  ;;  %2322 = vmatpush1.bf16.msra.mxu0 %v3955_v13  ;;  %5063 = vst [vmem:[#allocation71_spill] sm:$0xff] %v3975_v3  ;;  %v312_v49 = vld [vmem:[%s4889_s1 + $0x510] sm:$0xff] }
  0xae   :  { %2516 = vmatprep.subr.bf16.mxu1 %v3628_v63  ;;  %2324 = vmatprep.subr.bf16.mxu0 %v3958_v37  ;;  %v310_v63 = vld [vmem:[%s4889_s1 + $0x500] sm:$0xff]  ;;  %5066 = vst [vmem:[#allocation74_spill] sm:$0xff] %v3998_v20 }
  0xaf   :  { %v3995_v12 = vpack.c.bf16 %v312_v49, %v310_v63  ;;  %v319_v49 = vld [vmem:[%s4889_s1 + $0x548] sm:$0xff]  ;;  %v321_v63 = vld [vmem:[%s4889_s1 + $0x558] sm:$0xff] }
  0xb0   :  { %v4018_v36 = vpack.c.bf16 %v321_v63, %v319_v49 }
  0xb1   :  { %2518 = vmatpush1.bf16.msra.mxu1 %v3645_v42  ;;  %2326 = vmatpush1.bf16.msra.mxu0 %v3975_v3  ;;  %5065 = vst [vmem:[#allocation73_spill] sm:$0xff] %v3995_v12  ;;  %v316_v42 = vld [vmem:[%s4889_s1 + $0x530] sm:$0xff] }
  0xb2   :  { %2520 = vmatprep.subr.bf16.mxu1 %v3649_v55  ;;  %2328 = vmatprep.subr.bf16.mxu0 %v3978_v45  ;;  %v314_v55 = vld [vmem:[%s4889_s1 + $0x520] sm:$0xff]  ;;  %5068 = vst [vmem:[#allocation76_spill] sm:$0xff] %v4018_v36 }
  0xb3   :  { %v4015_v16 = vpack.c.bf16 %v316_v42, %v314_v55  ;;  %v323_v42 = vld [vmem:[%s4889_s1 + $0x568] sm:$0xff]  ;;  %v325_v55 = vld [vmem:[%s4889_s1 + $0x578] sm:$0xff] }
  0xb4   :  { %v4038_v63 = vpack.c.bf16 %v325_v55, %v323_v42 }
  0xb5   :  { %2522 = vmatpush1.bf16.msra.mxu1 %v3666_v17  ;;  %2330 = vmatpush1.bf16.msra.mxu0 %v3995_v12  ;;  %5067 = vst [vmem:[#allocation75_spill] sm:$0xff] %v4015_v16  ;;  %v320_v17 = vld [vmem:[%s4889_s1 + $0x550] sm:$0xff] }
  0xb6   :  { %2524 = vmatprep.subr.bf16.mxu1 %v3670_v15  ;;  %2332 = vmatprep.subr.bf16.mxu0 %v3998_v20  ;;  %v318_v15 = vld [vmem:[%s4889_s1 + $0x540] sm:$0xff]  ;;  %5070 = vst [vmem:[#allocation78_spill] sm:$0xff] %v4038_v63 }
  0xb7   :  { %v4035_v49 = vpack.c.bf16 %v320_v17, %v318_v15  ;;  %v327_v17 = vld [vmem:[%s4889_s1 + $0x588] sm:$0xff]  ;;  %v329_v15 = vld [vmem:[%s4889_s1 + $0x598] sm:$0xff] }
  0xb8   :  { %v4058_v55 = vpack.c.bf16 %v329_v15, %v327_v17  ;;  %v333_v17 = vld [vmem:[%s4889_s1 + $0x5b8] sm:$0xff] }
  0xb9   :  { %2526 = vmatpush1.bf16.msra.mxu1 %v3686_v57  ;;  %2334 = vmatpush1.bf16.msra.mxu0 %v4015_v16  ;;  %5069 = vst [vmem:[#allocation77_spill] sm:$0xff] %v4035_v49  ;;  %v324_v57 = vld [vmem:[%s4889_s1 + $0x570] sm:$0xff] }
  0xba   :  { %2528 = vmatprep.subr.bf16.mxu1 %v3690_v14  ;;  %2336 = vmatprep.subr.bf16.mxu0 %v4018_v36  ;;  %v322_v14 = vld [vmem:[%s4889_s1 + $0x560] sm:$0xff]  ;;  %5072 = vst [vmem:[#allocation80_spill] sm:$0xff] %v4058_v55 }
  0xbb   :  { %v4055_v42 = vpack.c.bf16 %v324_v57, %v322_v14  ;;  %v826_v57 = vsel %vm451_vm0, %v5074_v41, %v5073_v48  ;;  %v331_v14 = vld [vmem:[%s4889_s1 + $0x5a8] sm:$0xff]  ;;  %v330_v41 = vld [vmem:[%s4889_s1 + $0x5a0] sm:$0xff]  ;;  %v332_v48 = vld [vmem:[%s4889_s1 + $0x5b0] sm:$0xff] }
  0xbd   :  { %2530 = vmatpush1.bf16.msra.mxu1 %v3706_v6  ;;  %2338 = vmatpush1.bf16.msra.mxu0 %v4035_v49  ;;  %5071 = vst [vmem:[#allocation79_spill] sm:$0xff] %v4055_v42  ;;  %v328_v6 = vld [vmem:[%s4889_s1 + $0x590] sm:$0xff] }
  0xbe   :  { %2532 = vmatprep.subr.bf16.mxu1 %v3710_v21  ;;  %2340 = vmatprep.subr.bf16.mxu0 %v4038_v63  ;;  %v326_v21 = vld [vmem:[%s4889_s1 + $0x580] sm:$0xff] }
  0xbf   :  { %v4079_v15 = vpack.c.bf16 %v328_v6, %v326_v21  ;;  %v335_v6 = vld [vmem:[%s4889_s1 + $0x5c8] sm:$0xff]  ;;  %v337_v21 = vld [vmem:[%s4889_s1 + $0x5d8] sm:$0xff] }
  0xc1   :  { %2534 = vmatpush1.bf16.msra.mxu1 %v3726_v11  ;;  %2342 = vmatpush1.bf16.msra.mxu0 %v4055_v42  ;;  %5075 = vst [vmem:[#allocation22_spill] sm:$0xff] %v4079_v15  ;;  %v4082_v11 = vpack.c.bf16 %v333_v17, %v331_v14  ;;  %v4103_v14 = vpack.c.bf16 %v337_v21, %v335_v6  ;;  %v334_v17 = vld [vmem:[%s4889_s1 + $0x5c0] sm:$0xff] }
  0xc2   :  { %2536 = vmatprep.subr.bf16.mxu1 %v3730_v56  ;;  %2344 = vmatprep.subr.bf16.mxu0 %v4058_v55  ;;  %v338_v21 = vld [vmem:[%s4889_s1 + $0x5e0] sm:$0xff] }
  0xc3   :  { %5076 = vst [vmem:[#allocation81_spill] sm:$0xff] %v4082_v11  ;;  %5078 = vst [vmem:[#allocation83_spill] sm:$0xff] %v4103_v14 }
  0xc4   :  { %965 = vmatmul.mubr.f32.vlgmr.msra.gmra.mrb[2].mxu1 %v826_v57  ;;  %v4100_v57 = vpack.c.bf16 %v332_v48, %v330_v41  ;;  %v341_v41 = vld [vmem:[%s4889_s1 + $0x5f8] sm:$0xff] }
  0xc5   :  { %2538 = vmatpush1.bf16.msra.mxu1 %v3822_v46  ;;  %1035 = vmatprep.mubr.f32.mxu1 %v3786_v53  ;;  %v339_v53 = vld [vmem:[%s4889_s1 + $0x5e8] sm:$0xff]  ;;  %v5079_v46 = vunpack.i.h.bf16 %v3815_v25 }
  0xc6   :  { %2540 = vmatprep.subr.bf16.mxu1 %v3824_v31  ;;  %2346 = vmatpush1.bf16.msra.mxu0 %v4079_v15  ;;  %5077 = vst [vmem:[#allocation82_spill] sm:$0xff] %v4100_v57  ;;  %v336_v31 = vld [vmem:[%s4889_s1 + $0x5d0] sm:$0xff]  ;;  %v4123_v6 = vpack.c.bf16 %v341_v41, %v339_v53 }
  0xc7   :  { %2348 = vmatprep.subr.bf16.mxu0 %v4082_v11  ;;  %v4120_v48 = vpack.c.bf16 %v336_v31, %v334_v17  ;;  %v343_v31 = vld [vmem:[%s4889_s1 + $0x608] sm:$0xff]  ;;  %v345_v17 = vld [vmem:[%s4889_s1 + $0x618] sm:$0xff] }
  0xc8   :  { %v4143_v41 = vpack.c.bf16 %v345_v17, %v343_v31  ;;  %v450_v31 = vpop.permute.xlu0 %449 }
  0xc9   :  { %2542 = vmatpush1.bf16.msra.mxu1 %v3854_v0  ;;  %v348_v0 = vld [vmem:[%s4889_s1 + $0x630] sm:$0xff]  ;;  %v453_v56 = vsel %vm451_vm0, %v5079_v46, %v450_v31  ;;  %v350_v46 = vld [vmem:[%s4889_s1 + $0x640] sm:$0xff] }
  0xca   :  { %2544 = vmatprep.subr.bf16.mxu1 %v3857_v44  ;;  %2350 = vmatpush1.bf16.msra.mxu0 %v4100_v57  ;;  %v340_v44 = vld [vmem:[%s4889_s1 + $0x5f0] sm:$0xff] }
  0xcb   :  { %2352 = vmatprep.subr.bf16.mxu0 %v4103_v14  ;;  %v4140_v53 = vpack.c.bf16 %v340_v44, %v338_v21  ;;  %v347_v44 = vld [vmem:[%s4889_s1 + $0x628] sm:$0xff]  ;;  %v349_v21 = vld [vmem:[%s4889_s1 + $0x638] sm:$0xff] }
  0xcd   :  { %2546 = vmatpush1.bf16.msra.mxu1 %v3875_v18  ;;  %v344_v18 = vld [vmem:[%s4889_s1 + $0x610] sm:$0xff] }
  0xce   :  { %2548 = vmatprep.subr.bf16.mxu1 %v3878_v28  ;;  %2354 = vmatpush1.bf16.msra.mxu0 %v4120_v48  ;;  %v342_v28 = vld [vmem:[%s4889_s1 + $0x600] sm:$0xff] }
  0xcf   :  { %2356 = vmatprep.subr.bf16.mxu0 %v4123_v6  ;;  %v4160_v17 = vpack.c.bf16 %v344_v18, %v342_v28  ;;  %v351_v18 = vld [vmem:[%s4889_s1 + $0x648] sm:$0xff]  ;;  %v353_v28 = vld [vmem:[%s4889_s1 + $0x658] sm:$0xff] }
  0xd0   :  { %v4188_v25 = vpack.c.bf16 %v353_v28, %v351_v18  ;;  %v354_v28 = vld [vmem:[%s4889_s1 + $0x660] sm:$0xff] }
  0xd1   :  { %2550 = vmatpush1.bf16.msra.mxu1 %v3895_v58  ;;  %v4163_v58 = vpack.c.bf16 %v349_v21, %v347_v44  ;;  %v5080_v21 = vld [vmem:[#allocation25_spill] sm:$0xff] }
  0xd2   :  { %2552 = vmatprep.subr.bf16.mxu1 %v3898_v9  ;;  %2358 = vmatpush1.bf16.msra.mxu0 %v4140_v53  ;;  %v346_v9 = vld [vmem:[%s4889_s1 + $0x620] sm:$0xff] }
  0xd3   :  { %2360 = vmatprep.subr.bf16.mxu0 %v4143_v41  ;;  %v4183_v44 = vpack.c.bf16 %v348_v0, %v346_v9  ;;  %v355_v0 = vld [vmem:[%s4889_s1 + $0x668] sm:$0xff]  ;;  %v357_v9 = vld [vmem:[%s4889_s1 + $0x678] sm:$0xff] }
  0xd4   :  { %v4208_v18 = vpack.c.bf16 %v357_v9, %v355_v0 }
  0xd5   :  { %2554 = vmatpush1.bf16.msra.mxu1 %v3915_v33  ;;  %707 = vmatmul.mubr.f32.vlgmr.msra.gmra.mrb[0].mxu0 %v453_v56  ;;  %v352_v56 = vld [vmem:[%s4889_s1 + $0x650] sm:$0xff] }
  0xd6   :  { %2556 = vmatprep.subr.bf16.mxu1 %v3918_v60  ;;  %2362 = vmatpush1.bf16.msra.mxu0 %v4160_v17  ;;  %v4205_v31 = vpack.c.bf16 %v352_v56, %v350_v46  ;;  %v359_v46 = vld [vmem:[%s4889_s1 + $0x688] sm:$0xff]  ;;  %v361_v56 = vld [vmem:[%s4889_s1 + $0x698] sm:$0xff] }
  0xd7   :  { %2062 = vmatprep.mubr.msk.f32.mxu0 %vm451_vm0, %v5080_v21  ;;  %2364 = vmatprep.subr.bf16.mxu0 %v4163_v58  ;;  %v4228_v9 = vpack.c.bf16 %v361_v56, %v359_v46 }
  0xd9   :  { %2558 = vmatpush1.bf16.msra.mxu1 %v3935_v26  ;;  %v792_v26 = vpop.permute.xlu1 %791 }
  0xda   :  { %2560 = vmatprep.subr.bf16.mxu1 %v3938_v19  ;;  %2366 = vmatpush1.bf16.msra.mxu0 %v4183_v44  ;;  %v356_v19 = vld [vmem:[%s4889_s1 + $0x670] sm:$0xff] }
  0xdb   :  { %2368 = vmatprep.subr.bf16.mxu0 %v4188_v25  ;;  %v4225_v0 = vpack.c.bf16 %v356_v19, %v354_v28  ;;  %v363_v19 = vld [vmem:[%s4889_s1 + $0x6a8] sm:$0xff]  ;;  %v365_v28 = vld [vmem:[%s4889_s1 + $0x6b8] sm:$0xff] }
  0xdc   :  { %v4248_v56 = vpack.c.bf16 %v365_v28, %v363_v19 }
  0xdd   :  { %2562 = vmatpush1.bf16.msra.mxu1 %v3955_v13  ;;  %v360_v13 = vld [vmem:[%s4889_s1 + $0x690] sm:$0xff] }
  0xde   :  { %2564 = vmatprep.subr.bf16.mxu1 %v3958_v37  ;;  %2370 = vmatpush1.bf16.msra.mxu0 %v4205_v31  ;;  %v358_v37 = vld [vmem:[%s4889_s1 + $0x680] sm:$0xff] }
  0xdf   :  { %2372 = vmatprep.subr.bf16.mxu0 %v4208_v18  ;;  %v4245_v46 = vpack.c.bf16 %v360_v13, %v358_v37  ;;  %v367_v13 = vld [vmem:[%s4889_s1 + $0x6c8] sm:$0xff]  ;;  %v369_v37 = vld [vmem:[%s4889_s1 + $0x6d8] sm:$0xff] }
  0xe0   :  { %v4268_v28 = vpack.c.bf16 %v369_v37, %v367_v13 }
  0xe1   :  { %2566 = vmatpush1.bf16.msra.mxu1 %v3975_v3  ;;  %v364_v3 = vld [vmem:[%s4889_s1 + $0x6b0] sm:$0xff] }
  0xe2   :  { %2568 = vmatprep.subr.bf16.mxu1 %v3978_v45  ;;  %2374 = vmatpush1.bf16.msra.mxu0 %v4225_v0  ;;  %v362_v45 = vld [vmem:[%s4889_s1 + $0x6a0] sm:$0xff] }
  0xe3   :  { %2376 = vmatprep.subr.bf16.mxu0 %v4228_v9  ;;  %v4265_v19 = vpack.c.bf16 %v364_v3, %v362_v45  ;;  %v371_v3 = vld [vmem:[%s4889_s1 + $0x6e8] sm:$0xff]  ;;  %v373_v45 = vld [vmem:[%s4889_s1 + $0x6f8] sm:$0xff] }
  0xe4   :  { %v4288_v37 = vpack.c.bf16 %v373_v45, %v371_v3 }
  0xe5   :  { %2570 = vmatpush1.bf16.msra.mxu1 %v3995_v12  ;;  %v368_v12 = vld [vmem:[%s4889_s1 + $0x6d0] sm:$0xff] }
  0xe6   :  { %2572 = vmatprep.subr.bf16.mxu1 %v3998_v20  ;;  %2378 = vmatpush1.bf16.msra.mxu0 %v4245_v46  ;;  %v366_v20 = vld [vmem:[%s4889_s1 + $0x6c0] sm:$0xff] }
  0xe7   :  { %2380 = vmatprep.subr.bf16.mxu0 %v4248_v56  ;;  %v4285_v13 = vpack.c.bf16 %v368_v12, %v366_v20  ;;  %v375_v12 = vld [vmem:[%s4889_s1 + $0x708] sm:$0xff]  ;;  %v377_v20 = vld [vmem:[%s4889_s1 + $0x718] sm:$0xff] }
  0xe8   :  { %v4308_v45 = vpack.c.bf16 %v377_v20, %v375_v12 }
  0xe9   :  { %2574 = vmatpush1.bf16.msra.mxu1 %v4015_v16  ;;  %v372_v16 = vld [vmem:[%s4889_s1 + $0x6f0] sm:$0xff] }
  0xea   :  { %2576 = vmatprep.subr.bf16.mxu1 %v4018_v36  ;;  %2382 = vmatpush1.bf16.msra.mxu0 %v4265_v19  ;;  %v370_v36 = vld [vmem:[%s4889_s1 + $0x6e0] sm:$0xff] }
  0xeb   :  { %2384 = vmatprep.subr.bf16.mxu0 %v4268_v28  ;;  %v4305_v3 = vpack.c.bf16 %v372_v16, %v370_v36  ;;  %v379_v16 = vld [vmem:[%s4889_s1 + $0x728] sm:$0xff]  ;;  %v381_v36 = vld [vmem:[%s4889_s1 + $0x738] sm:$0xff] }
  0xec   :  { %v4328_v20 = vpack.c.bf16 %v381_v36, %v379_v16 }
  0xed   :  { %2578 = vmatpush1.bf16.msra.mxu1 %v4035_v49  ;;  %v376_v49 = vld [vmem:[%s4889_s1 + $0x710] sm:$0xff] }
  0xee   :  { %2580 = vmatprep.subr.bf16.mxu1 %v4038_v63  ;;  %2386 = vmatpush1.bf16.msra.mxu0 %v4285_v13  ;;  %v374_v63 = vld [vmem:[%s4889_s1 + $0x700] sm:$0xff] }
  0xef   :  { %2388 = vmatprep.subr.bf16.mxu0 %v4288_v37  ;;  %v4325_v12 = vpack.c.bf16 %v376_v49, %v374_v63  ;;  %v383_v49 = vld [vmem:[%s4889_s1 + $0x748] sm:$0xff]  ;;  %v385_v63 = vld [vmem:[%s4889_s1 + $0x758] sm:$0xff] }
  0xf0   :  { %v4348_v36 = vpack.c.bf16 %v385_v63, %v383_v49 }
  0xf1   :  { %2582 = vmatpush1.bf16.msra.mxu1 %v4055_v42  ;;  %v380_v42 = vld [vmem:[%s4889_s1 + $0x730] sm:$0xff] }
  0xf2   :  { %2584 = vmatprep.subr.bf16.mxu1 %v4058_v55  ;;  %2390 = vmatpush1.bf16.msra.mxu0 %v4305_v3  ;;  %v378_v55 = vld [vmem:[%s4889_s1 + $0x720] sm:$0xff] }
  0xf3   :  { %2392 = vmatprep.subr.bf16.mxu0 %v4308_v45  ;;  %v4345_v16 = vpack.c.bf16 %v380_v42, %v378_v55  ;;  %v387_v42 = vld [vmem:[%s4889_s1 + $0x768] sm:$0xff]  ;;  %v389_v55 = vld [vmem:[%s4889_s1 + $0x778] sm:$0xff] }
  0xf4   :  { %v4368_v63 = vpack.c.bf16 %v389_v55, %v387_v42  ;;  %v5082_v55 = vld [vmem:[#allocation2_spill] sm:$0xff] }
  0xf5   :  { %2586 = vmatpush1.bf16.msra.mxu1 %v4079_v15  ;;  %v384_v15 = vld [vmem:[%s4889_s1 + $0x750] sm:$0xff] }
  0xf6   :  { %2588 = vmatprep.subr.bf16.mxu1 %v4082_v11  ;;  %2394 = vmatpush1.bf16.msra.mxu0 %v4325_v12  ;;  %v382_v11 = vld [vmem:[%s4889_s1 + $0x740] sm:$0xff] }
  0xf7   :  { %2396 = vmatprep.subr.bf16.mxu0 %v4328_v20  ;;  %v4365_v49 = vpack.c.bf16 %v384_v15, %v382_v11  ;;  %v5081_v15 = vunpack.i.h.bf16 %v3826_v23  ;;  %v5084_v23 = vld [vmem:[#allocation3_spill] sm:$0xff] }
  0xf9   :  { %2590 = vmatpush1.bf16.msra.mxu1 %v4100_v57  ;;  %v388_v57 = vld [vmem:[%s4889_s1 + $0x770] sm:$0xff]  ;;  %v794_v42 = vsel %vm451_vm0, %v5081_v15, %v792_v26  ;;  %v5085_v26 = vld [vmem:[#allocation5_spill] sm:$0xff] }
  0xfa   :  { %2592 = vmatprep.subr.bf16.mxu1 %v4103_v14  ;;  %2398 = vmatpush1.bf16.msra.mxu0 %v4345_v16  ;;  %v386_v14 = vld [vmem:[%s4889_s1 + $0x760] sm:$0xff]  ;;  %v5088_v15 = vld [vmem:[#allocation9_spill] sm:$0xff] }
  0xfb   :  { %2400 = vmatprep.subr.bf16.mxu0 %v4348_v36  ;;  %v4379_v11 = vpack.c.bf16 %v388_v57, %v386_v14  ;;  %v5083_v57 = vld [vmem:[#allocation21_spill] sm:$0xff]  ;;  %v5086_v14 = vld [vmem:[#allocation6_spill] sm:$0xff] }
  0xfd   :  { %2594 = vmatpush1.bf16.msra.mxu1 %v4120_v48 }
  0xfe   :  { %2596 = vmatprep.subr.bf16.mxu1 %v4123_v6  ;;  %2402 = vmatpush1.bf16.msra.mxu0 %v4365_v49 }
  0xff   :  { %2404 = vmatprep.subr.bf16.mxu0 %v4368_v63 }
 0x101   :  { %2598 = vmatpush1.bf16.msra.mxu1 %v4140_v53 }
 0x102   :  { %2600 = vmatprep.subr.bf16.mxu1 %v4143_v41  ;;  %2406 = vmatpush1.bf16.msra.mxu0 %v4379_v11 }
 0x103   :  { %2648 = vmatprep.subr.bf16.mxu0 %v5082_v55  ;;  %v5110_v55 = vld [vmem:[#allocation41_spill] sm:$0xff] }
 0x104   :  { %1036 = vmatmul.mubr.f32.vlgmr.msra.gmra.mrb[2].mxu1 %v794_v42 }
 0x105   :  { %2602 = vmatpush1.bf16.msra.mxu1 %v4160_v17  ;;  %2063 = vmatprep.mubr.msk.f32.mxu1 %vm451_vm0, %v3801_v50  ;;  %v5087_v50 = vld [vmem:[#allocation8_spill] sm:$0xff] }
 0x106   :  { %2604 = vmatprep.subr.bf16.mxu1 %v4163_v58  ;;  %778 = vmatmul.mubr.f32.vlgmr.msra.gmra.mrb[0].mxu0 %v5083_v57 }
 0x107   :  { %2650 = vmatpush1.bf16.msra.mxu0 %v3067_v10  ;;  %1220 = vmatprep.mubr.f32.mxu0 %v5083_v57  ;;  %v5111_v57 = vld [vmem:[#allocation42_spill] sm:$0xff] }
 0x108   :  { %2652 = vmatprep.subr.bf16.mxu0 %v5084_v23  ;;  %v5112_v23 = vld [vmem:[#allocation43_spill] sm:$0xff] }
 0x109   :  { %2606 = vmatpush1.bf16.msra.mxu1 %v4183_v44 }
 0x10a   :  { %2608 = vmatprep.subr.bf16.mxu1 %v4188_v25 }
 0x10b   :  { %2654 = vmatpush1.bf16.msra.mxu0 %v5085_v26  ;;  %v5113_v26 = vld [vmem:[#allocation56_spill] sm:$0xff] }
 0x10c   :  { %2656 = vmatprep.subr.bf16.mxu0 %v5086_v14  ;;  %v5114_v14 = vld [vmem:[#allocation55_spill] sm:$0xff] }
 0x10d   :  { %2610 = vmatpush1.bf16.msra.mxu1 %v4205_v31 }
 0x10e   :  { %2612 = vmatprep.subr.bf16.mxu1 %v4208_v18 }
 0x10f   :  { %2658 = vmatpush1.bf16.msra.mxu0 %v5087_v50  ;;  %v115_v50 = vcombine.high %v5114_v14, %v5113_v26  ;;  %v1457_v26 = vld [vmem:[%s4891_s3 + $0x8] sm:$0xff]  ;;  %v1474_v14 = vld [vmem:[%s4891_s3 + $0x90] sm:$0xff] }
 0x110   :  { %2660 = vmatprep.subr.bf16.mxu0 %v5088_v15  ;;  %v5115_v15 = vld [vmem:[#allocation44_spill] sm:$0xff] }
 0x111   :  { %2614 = vmatpush1.bf16.msra.mxu1 %v4225_v0 }
 0x112   :  { %2616 = vmatprep.subr.bf16.mxu1 %v4228_v9 }
 0x113   :  { %2662 = vmatpush1.bf16.msra.mxu0 %v3139_v39  ;;  %v5089_v39 = vld [vmem:[#allocation34_spill] sm:$0xff] }
 0x114   :  { %2664 = vmatprep.subr.bf16.mxu0 %v3142_v40  ;;  %v5090_v40 = vld [vmem:[#allocation36_spill] sm:$0xff] }
 0x115   :  { %2618 = vmatpush1.bf16.msra.mxu1 %v4245_v46 }
 0x116   :  { %2620 = vmatprep.subr.bf16.mxu1 %v4248_v56 }
 0x117   :  { %v4411_v10 = vpop.f32.mrb[0].mxu1  ;;  %2666 = vmatpush1.bf16.msra.mxu0 %v3163_v51  ;;  %v5091_v51 = vld [vmem:[#allocation38_spill] sm:$0xff] }
 0x118   :  { %v4414_v42 = vpop.f32.mrb[1].mxu1  ;;  %2668 = vmatprep.subr.bf16.mxu0 %v3172_v54  ;;  %v4449_v54 = vpop.permute.xlu0 %3003 }
 0x119   :  { %2622 = vmatpush1.bf16.msra.mxu1 %v4265_v19 }
 0x11a   :  { %2624 = vmatprep.subr.bf16.mxu1 %v4268_v28 }
 0x11b   :  { %2670 = vmatpush1.bf16.msra.mxu0 %v3203_v2  ;;  %v3006_v2 = vunpack.i.h.bf16 %v4449_v54 }
 0x11c   :  { %2672 = vmatprep.subr.bf16.mxu0 %v3210_v8  ;;  %v3005_v8 = vunpack.i.l.bf16 %v4449_v54 }
 0x11d   :  { %2626 = vmatpush1.bf16.msra.mxu1 %v4285_v13 }
 0x11e   :  { %2628 = vmatprep.subr.bf16.mxu1 %v4288_v37 }
 0x11f   :  { %2674 = vmatpush1.bf16.msra.mxu0 %v3242_v29  ;;  %v1120_v29 = vsel %vm451_vm0, %v3005_v8, %v3006_v2 }
 0x120   :  { %2676 = vmatprep.subr.bf16.mxu0 %v3244_v30  ;;  %v5092_v30 = vld [vmem:[#allocation17_spill] sm:$0xff] }
 0x121   :  { %2630 = vmatpush1.bf16.msra.mxu1 %v4305_v3 }
 0x122   :  { %2632 = vmatprep.subr.bf16.mxu1 %v4308_v45 }
 0x123   :  { %2678 = vmatpush1.bf16.msra.mxu0 %v3298_v61  ;;  %v5093_v61 = vld [vmem:[#allocation18_spill] sm:$0xff] }
 0x124   :  { %2680 = vmatprep.subr.bf16.mxu0 %v3314_v7  ;;  %v5094_v7 = vld [vmem:[#allocation19_spill] sm:$0xff] }
 0x125   :  { %2634 = vmatpush1.bf16.msra.mxu1 %v4325_v12 }
 0x126   :  { %2636 = vmatprep.subr.bf16.mxu1 %v4328_v20 }
 0x127   :  { %2682 = vmatpush1.bf16.msra.mxu0 %v3346_v24  ;;  %v5095_v24 = vld [vmem:[#allocation20_spill] sm:$0xff] }
 0x128   :  { %2684 = vmatprep.subr.bf16.mxu0 %v3361_v35  ;;  %v5096_v35 = vld [vmem:[#allocation23_spill] sm:$0xff] }
 0x129   :  { %2638 = vmatpush1.bf16.msra.mxu1 %v4345_v16 }
 0x12a   :  { %2640 = vmatprep.subr.bf16.mxu1 %v4348_v36 }
 0x12b   :  { %2686 = vmatpush1.bf16.msra.mxu0 %v3389_v47  ;;  %v5099_v47 = vld [vmem:[#allocation27_spill] sm:$0xff] }
 0x12c   :  { %2688 = vmatprep.subr.bf16.mxu0 %v3404_v4  ;;  %v5100_v4 = vld [vmem:[#allocation28_spill] sm:$0xff] }
 0x12d   :  { %2642 = vmatpush1.bf16.msra.mxu1 %v4365_v49 }
 0x12e   :  { %2644 = vmatprep.subr.bf16.mxu1 %v4368_v63 }
 0x12f   :  { %2690 = vmatpush1.bf16.msra.mxu0 %v3427_v22  ;;  %v5102_v22 = vld [vmem:[#allocation30_spill] sm:$0xff] }
 0x130   :  { %2692 = vmatprep.subr.bf16.mxu0 %v3442_v38  ;;  %v5103_v38 = vld [vmem:[#allocation31_spill] sm:$0xff] }
 0x131   :  { %2646 = vmatpush1.bf16.msra.mxu1 %v4379_v11 }
 0x133   :  { %2694 = vmatpush1.bf16.msra.mxu0 %v3463_v5  ;;  %v5104_v5 = vld [vmem:[#allocation32_spill] sm:$0xff] }
 0x134   :  { %1107 = vmatmul.mubr.f32.vlgmr.msra.gmra.mrb[2].mxu1 %v3789_v1  ;;  %2696 = vmatprep.subr.bf16.mxu0 %v3478_v27  ;;  %v5105_v27 = vld [vmem:[#allocation33_spill] sm:$0xff] }
 0x135   :  { %v5107_v1 = vld [vmem:[#allocation37_spill] sm:$0xff] }
 0x137   :  { %2698 = vmatpush1.bf16.msra.mxu0 %v3499_v62  ;;  %v5106_v62 = vld [vmem:[#allocation35_spill] sm:$0xff] }
 0x138   :  { %2700 = vmatprep.subr.bf16.mxu0 %v5089_v39  ;;  %v5116_v39 = vld [vmem:[#allocation45_spill] sm:$0xff] }
 0x13b   :  { %2702 = vmatpush1.bf16.msra.mxu0 %v5090_v40  ;;  %v5117_v40 = vld [vmem:[#allocation7_spill] sm:$0xff] }
 0x13c   :  { %2704 = vmatprep.subr.bf16.mxu0 %v5091_v51  ;;  %v4487_v51 = vrot.slane %v115_v50, %v5117_v40  ;;  %v1475_v50 = vld [vmem:[%s4891_s3 + $0x98] sm:$0xff] }
 0x13f   :  { %2706 = vmatpush1.bf16.msra.mxu0 %v3574_v43  ;;  %v5097_v43 = vld [vmem:[#allocation24_spill] sm:$0xff] }
 0x140   :  { %2708 = vmatprep.subr.bf16.mxu0 %v3589_v52  ;;  %v5108_v52 = vld [vmem:[#allocation39_spill] sm:$0xff] }
 0x143   :  { %2710 = vmatpush1.bf16.msra.mxu0 %v3601_v34  ;;  %v5109_v34 = vld [vmem:[#allocation40_spill] sm:$0xff] }
 0x144   :  { %2712 = vmatprep.subr.bf16.mxu0 %v3248_v32  ;;  %v5098_v32 = vld [vmem:[#allocation26_spill] sm:$0xff] }
 0x146   :  { %1221 = vmatmul.mubr.f32.vlgmr.msra.gmra.mrb[2].mxu0 %v3292_v59  ;;  %v5101_v59 = vld [vmem:[#allocation29_spill] sm:$0xff] }
 0x147   :  { %2714 = vmatpush1.bf16.msra.mxu0 %v5092_v30  ;;  %1291 = vmatprep.mubr.f32.mxu0 %v1120_v29  ;;  %v5118_v29 = vld [vmem:[#allocation46_spill] sm:$0xff]  ;;  %v5119_v30 = vld [vmem:[#allocation47_spill] sm:$0xff] }
 0x148   :  { %2716 = vmatprep.subr.bf16.mxu0 %v5093_v61  ;;  %v5120_v61 = vld [vmem:[#allocation10_spill] sm:$0xff] }
 0x14b   :  { %2718 = vmatpush1.bf16.msra.mxu0 %v5094_v7  ;;  %v144_v7 = vmax.f32 %v5120_v61, 0.0 }
 0x14c   :  { %2720 = vmatprep.subr.bf16.mxu0 %v5095_v24  ;;  %v149_v24 = vmax.f32 %v4487_v51, 0.0 }
 0x14f   :  { %2722 = vmatpush1.bf16.msra.mxu0 %v5096_v35  ;;  %v5121_v35 = vld [vmem:[#allocation48_spill] sm:$0xff] }
 0x150   :  { %2724 = vmatprep.subr.bf16.mxu0 %v5097_v43  ;;  %v5122_v43 = vld [vmem:[#allocation49_spill] sm:$0xff] }
 0x153   :  { %2726 = vmatpush1.bf16.msra.mxu0 %v5098_v32  ;;  %v1127_v32 = vcombine.low %v144_v7, %v149_v24  ;;  %v1459_v7 = vld [vmem:[%s4891_s3 + $0x18] sm:$0xff]  ;;  %v1476_v24 = vld [vmem:[%s4891_s3 + $0xa0] sm:$0xff] }
 0x154   :  { %2728 = vmatprep.subr.bf16.mxu0 %v5099_v47  ;;  %v5123_v47 = vld [vmem:[#allocation50_spill] sm:$0xff] }
 0x157   :  { %2730 = vmatpush1.bf16.msra.mxu0 %v5100_v4  ;;  %v5124_v4 = vld [vmem:[#allocation51_spill] sm:$0xff] }
 0x158   :  { %2732 = vmatprep.subr.bf16.mxu0 %v5101_v59  ;;  %v4498_v59 = vrot.slane %v1127_v32, %v5117_v40 }
 0x15b   :  { %2734 = vmatpush1.bf16.msra.mxu0 %v5102_v22  ;;  %v5125_v22 = vld [vmem:[#allocation52_spill] sm:$0xff] }
 0x15c   :  { %2736 = vmatprep.subr.bf16.mxu0 %v5103_v38  ;;  %v5126_v38 = vld [vmem:[#allocation53_spill] sm:$0xff] }
 0x15f   :  { %2738 = vmatpush1.bf16.msra.mxu0 %v5104_v5  ;;  %v1153_v5 = vsel %vm451_vm0, %v5080_v21, %v3005_v8  ;;  %v1472_v21 = vld [vmem:[%s4891_s3 + $0x80] sm:$0xff]  ;;  %v1473_v8 = vld [vmem:[%s4891_s3 + $0x88] sm:$0xff] }
 0x160   :  { %2740 = vmatprep.subr.bf16.mxu0 %v5105_v27  ;;  %v4506_v27 = vrot.slane %v4498_v59, %v5117_v40 }
 0x163   :  { %2742 = vmatpush1.bf16.msra.mxu0 %v5106_v62  ;;  %v5127_v62 = vld [vmem:[#allocation54_spill] sm:$0xff] }
 0x164   :  { %2744 = vmatprep.subr.bf16.mxu0 %v5107_v1  ;;  %v5128_v1 = vld [vmem:[#allocation59_spill] sm:$0xff] }
 0x167   :  { %2746 = vmatpush1.bf16.msra.mxu0 %v5108_v52  ;;  %v5129_v52 = vld [vmem:[#allocation60_spill] sm:$0xff] }
 0x168   :  { %2748 = vmatprep.subr.bf16.mxu0 %v5109_v34  ;;  %v5130_v34 = vld [vmem:[#allocation61_spill] sm:$0xff] }
 0x16b   :  { %2750 = vmatpush1.bf16.msra.mxu0 %v5110_v55  ;;  %v5131_v55 = vld [vmem:[#allocation62_spill] sm:$0xff] }
 0x16c   :  { %2752 = vmatprep.subr.bf16.mxu0 %v5111_v57  ;;  %v1456_v57 = vld [vmem:[%s4891_s3] sm:$0xff] }
 0x16f   :  { %2754 = vmatpush1.bf16.msra.mxu0 %v5112_v23  ;;  %v2887_v23 = vpack.c.bf16 %v1473_v8, %v1472_v21  ;;  %v1463_v21 = vld [vmem:[%s4891_s3 + $0x38] sm:$0xff]  ;;  %v1480_v8 = vld [vmem:[%s4891_s3 + $0xc0] sm:$0xff] }
 0x170   :  { %2756 = vmatprep.subr.bf16.mxu0 %v5115_v15  ;;  %v5132_v15 = vld [vmem:[#allocation63_spill] sm:$0xff] }
 0x171   :  { %2888 = vmatprep.subr.bf16.mxu1 %v2887_v23 }
 0x173   :  { %2758 = vmatpush1.bf16.msra.mxu0 %v5116_v39  ;;  %v2889_v39 = vpack.c.bf16 %v1457_v26, %v1456_v57  ;;  %v1481_v57 = vld [vmem:[%s4891_s3 + $0xc8] sm:$0xff] }
 0x174   :  { %2760 = vmatprep.subr.bf16.mxu0 %v5118_v29  ;;  %v2891_v29 = vpack.c.bf16 %v1475_v50, %v1474_v14  ;;  %v2903_v26 = vpack.c.bf16 %v1481_v57, %v1480_v8  ;;  %v1464_v14 = vld [vmem:[%s4891_s3 + $0x40] sm:$0xff]  ;;  %v5136_v50 = vld [vmem:[#allocation67_spill] sm:$0xff]  ;;  %v1470_v8 = vld [vmem:[%s4891_s3 + $0x70] sm:$0xff] }
 0x175   :  { %2890 = vmatpush3.bf16.msra.mxu1 %v2889_v39  ;;  %v5137_v39 = vld [vmem:[#allocation68_spill] sm:$0xff]  ;;  %v1471_v57 = vld [vmem:[%s4891_s3 + $0x78] sm:$0xff] }
 0x176   :  { %2892 = vmatprep.subr.bf16.mxu1 %v2891_v29 }
 0x177   :  { %2762 = vmatpush1.bf16.msra.mxu0 %v5119_v30  ;;  %v1458_v30 = vld [vmem:[%s4891_s3 + $0x10] sm:$0xff] }
 0x178   :  { %2764 = vmatprep.subr.bf16.mxu0 %v5121_v35  ;;  %v5133_v35 = vld [vmem:[#allocation64_spill] sm:$0xff]  ;;  %v2893_v32 = vpack.c.bf16 %v1459_v7, %v1458_v30 }
 0x179   :  { %v1466_v7 = vld [vmem:[%s4891_s3 + $0x50] sm:$0xff] }
 0x17a   :  { %2894 = vmatpush3.bf16.msra.mxu1 %v2893_v32  ;;  %v1485_v32 = vld [vmem:[%s4891_s3 + $0xe8] sm:$0xff] }
 0x17b   :  { %2766 = vmatpush1.bf16.msra.mxu0 %v5122_v43  ;;  %v1477_v43 = vld [vmem:[%s4891_s3 + $0xa8] sm:$0xff] }
 0x17c   :  { %2768 = vmatprep.subr.bf16.mxu0 %v5123_v47  ;;  %v2895_v47 = vpack.c.bf16 %v1477_v43, %v1476_v24  ;;  %v1467_v24 = vld [vmem:[%s4891_s3 + $0x58] sm:$0xff]  ;;  %v1484_v43 = vld [vmem:[%s4891_s3 + $0xe0] sm:$0xff] }
 0x17e   :  { %2896 = vmatprep.subr.bf16.mxu1 %v2895_v47  ;;  %v5139_v47 = vld [vmem:[#allocation70_spill] sm:$0xff] }
 0x17f   :  { %2770 = vmatpush1.bf16.msra.mxu0 %v5124_v4  ;;  %v1460_v4 = vld [vmem:[%s4891_s3 + $0x20] sm:$0xff] }
 0x180   :  { %2772 = vmatprep.subr.bf16.mxu0 %v5125_v22  ;;  %v1461_v22 = vld [vmem:[%s4891_s3 + $0x28] sm:$0xff] }
 0x183   :  { %2774 = vmatpush1.bf16.msra.mxu0 %v5126_v38  ;;  %v5134_v38 = vld [vmem:[#allocation65_spill] sm:$0xff] }
 0x184   :  { %2776 = vmatprep.subr.bf16.mxu0 %v5127_v62  ;;  %v1479_v62 = vld [vmem:[%s4891_s3 + $0xb8] sm:$0xff] }
 0x186   :  { %1292 = vmatmul.mubr.f32.vlgmr.msra.gmra.mrb[2].mxu0 %v1153_v5  ;;  %v1478_v5 = vld [vmem:[%s4891_s3 + $0xb0] sm:$0xff] }
 0x187   :  { %2778 = vmatpush1.bf16.msra.mxu0 %v5128_v1  ;;  %1362 = vmatprep.mubr.f32.mxu0 %v4506_v27  ;;  %v5135_v1 = vld [vmem:[#allocation66_spill] sm:$0xff] }
 0x188   :  { %2780 = vmatprep.subr.bf16.mxu0 %v5129_v52  ;;  %v2897_v52 = vpack.c.bf16 %v1461_v22, %v1460_v4  ;;  %v2909_v4 = vpack.c.bf16 %v1467_v24, %v1466_v7  ;;  %v2911_v22 = vpack.c.bf16 %v1485_v32, %v1484_v43  ;;  %v5151_v7 = vld [vmem:[#allocation81_spill] sm:$0xff]  ;;  %v5152_v24 = vld [vmem:[#allocation82_spill] sm:$0xff]  ;;  %v1119_v43 = vpop.permute.xlu1 %1118  ;;  %v1150_v32 = vcombine.high %v4506_v27, %v4506_v27 }
 0x18a   :  { %2898 = vmatpush3.bf16.msra.mxu1 %v2897_v52  ;;  %v1487_v52 = vld [vmem:[%s4891_s3 + $0xf8] sm:$0xff] }
 0x18b   :  { %2782 = vmatpush1.bf16.msra.mxu0 %v5130_v34  ;;  %v2899_v34 = vpack.c.bf16 %v1479_v62, %v1478_v5  ;;  %v1469_v5 = vld [vmem:[%s4891_s3 + $0x68] sm:$0xff] }
 0x18c   :  { %2784 = vmatprep.subr.bf16.mxu0 %v5131_v55  ;;  %v1462_v55 = vld [vmem:[%s4891_s3 + $0x30] sm:$0xff]  ;;  %v5140_v62 = vld [vmem:[#allocation71_spill] sm:$0xff] }
 0x18d   :  { %v2901_v23 = vpack.c.bf16 %v1463_v21, %v1462_v55  ;;  %2900 = vmatprep.subr.bf16.mxu1 %v2899_v34  ;;  %v5141_v34 = vld [vmem:[#allocation72_spill] sm:$0xff] }
 0x18f   :  { %2786 = vmatpush1.bf16.msra.mxu0 %v5132_v15  ;;  %v1482_v15 = vld [vmem:[%s4891_s3 + $0xd0] sm:$0xff]  ;;  %2902 = vmatpush3.bf16.msra.mxu1 %v2901_v23  ;;  %v5142_v23 = vld [vmem:[#allocation73_spill] sm:$0xff] }
 0x190   :  { %2788 = vmatprep.subr.bf16.mxu0 %v5133_v35  ;;  %2904 = vmatprep.subr.bf16.mxu1 %v2903_v26  ;;  %v5138_v35 = vld [vmem:[#allocation69_spill] sm:$0xff]  ;;  %v5143_v26 = vld [vmem:[#allocation74_spill] sm:$0xff] }
 0x193   :  { %2790 = vmatpush1.bf16.msra.mxu0 %v5134_v38  ;;  %v1468_v38 = vld [vmem:[%s4891_s3 + $0x60] sm:$0xff] }
 0x194   :  { %2792 = vmatprep.subr.bf16.mxu0 %v5135_v1  ;;  %v1486_v1 = vld [vmem:[%s4891_s3 + $0xf0] sm:$0xff]  ;;  %v2913_v55 = vpack.c.bf16 %v1469_v5, %v1468_v38  ;;  %v1508_v38 = vld [vmem:[%s4891_s3 + $0x1a0] sm:$0xff]  ;;  %v1509_v5 = vld [vmem:[%s4891_s3 + $0x1a8] sm:$0xff] }
 0x195   :  { %v2915_v21 = vpack.c.bf16 %v1487_v52, %v1486_v1  ;;  %v2927_v1 = vpack.c.bf16 %v1509_v5, %v1508_v38  ;;  %v1492_v52 = vld [vmem:[%s4891_s3 + $0x120] sm:$0xff] }
 0x197   :  { %2794 = vmatpush1.bf16.msra.mxu0 %v3915_v33  ;;  %v1465_v33 = vld [vmem:[%s4891_s3 + $0x48] sm:$0xff] }
 0x198   :  { %2796 = vmatprep.subr.bf16.mxu0 %v3918_v60  ;;  %v1483_v60 = vld [vmem:[%s4891_s3 + $0xd8] sm:$0xff]  ;;  %v2905_v29 = vpack.c.bf16 %v1465_v33, %v1464_v14  ;;  %v2917_v14 = vpack.c.bf16 %v1471_v57, %v1470_v8  ;;  %v5144_v33 = vld [vmem:[#allocation75_spill] sm:$0xff] }
 0x199   :  { %v2907_v30 = vpack.c.bf16 %v1483_v60, %v1482_v15  ;;  %v5146_v15 = vld [vmem:[#allocation77_spill] sm:$0xff]  ;;  %v5147_v60 = vld [vmem:[#allocation78_spill] sm:$0xff] }
 0x19a   :  { %2906 = vmatpush3.bf16.msra.mxu1 %v2905_v29  ;;  %v5149_v29 = vld [vmem:[#allocation80_spill] sm:$0xff] }
 0x19b   :  { %2798 = vmatpush1.bf16.msra.mxu0 %v5136_v50  ;;  %2908 = vmatprep.subr.bf16.mxu1 %v2907_v30  ;;  %v5145_v50 = vld [vmem:[#allocation76_spill] sm:$0xff]  ;;  %v5150_v30 = vld [vmem:[#allocation22_spill] sm:$0xff] }
 0x19c   :  { %2800 = vmatprep.subr.bf16.mxu0 %v5137_v39  ;;  %v5148_v39 = vld [vmem:[#allocation79_spill] sm:$0xff] }
 0x19e   :  { %2910 = vmatpush3.bf16.msra.mxu1 %v2909_v4  ;;  %v1490_v4 = vld [vmem:[%s4891_s3 + $0x110] sm:$0xff] }
 0x19f   :  { %2802 = vmatpush1.bf16.msra.mxu0 %v5138_v35  ;;  %2912 = vmatprep.subr.bf16.mxu1 %v2911_v22  ;;  %v5153_v35 = vld [vmem:[#allocation83_spill] sm:$0xff]  ;;  %v1491_v22 = vld [vmem:[%s4891_s3 + $0x118] sm:$0xff] }
 0x1a0   :  { %2804 = vmatprep.subr.bf16.mxu0 %v5139_v47  ;;  %v1121_v47 = vsel %vm451_vm0, %v3006_v2, %v1119_v43  ;;  %v1499_v43 = vld [vmem:[%s4891_s3 + $0x158] sm:$0xff] }
 0x1a2   :  { %2914 = vmatpush3.bf16.msra.mxu1 %v2913_v55  ;;  %v1510_v55 = vld [vmem:[%s4891_s3 + $0x1b0] sm:$0xff] }
 0x1a3   :  { %2806 = vmatpush1.bf16.msra.mxu0 %v5140_v62  ;;  %2916 = vmatprep.subr.bf16.mxu1 %v2915_v21  ;;  %v2925_v62 = vpack.c.bf16 %v1491_v22, %v1490_v4  ;;  %v1511_v21 = vld [vmem:[%s4891_s3 + $0x1b8] sm:$0xff] }
 0x1a4   :  { %2808 = vmatprep.subr.bf16.mxu0 %v5141_v34  ;;  %v1493_v34 = vld [vmem:[%s4891_s3 + $0x128] sm:$0xff]  ;;  %v2931_v57 = vpack.c.bf16 %v1511_v21, %v1510_v55  ;;  %v1527_v4 = vld [vmem:[%s4891_s3 + $0x238] sm:$0xff] }
 0x1a5   :  { %v2929_v8 = vpack.c.bf16 %v1493_v34, %v1492_v52  ;;  %v2065_v34 = vld [vmem:[%s4893_s4] ss:$0 sm:$0xff] }
 0x1a6   :  { %2918 = vmatpush3.bf16.msra.mxu1 %v2917_v14  ;;  %v1512_v14 = vld [vmem:[%s4891_s3 + $0x1c0] sm:$0xff] }
 0x1a7   :  { %2810 = vmatpush1.bf16.msra.mxu0 %v5142_v23  ;;  %v1494_v23 = vld [vmem:[%s4891_s3 + $0x130] sm:$0xff] }
 0x1a8   :  { %2812 = vmatprep.subr.bf16.mxu0 %v5143_v26  ;;  %v1495_v26 = vld [vmem:[%s4891_s3 + $0x138] sm:$0xff] }
 0x1ab   :  { %2814 = vmatpush1.bf16.msra.mxu0 %v5144_v33  ;;  %v1513_v33 = vld [vmem:[%s4891_s3 + $0x1c8] sm:$0xff] }
 0x1ac   :  { %2816 = vmatprep.subr.bf16.mxu0 %v5145_v50  ;;  %v2933_v50 = vpack.c.bf16 %v1495_v26, %v1494_v23 }
 0x1af   :  { %2818 = vmatpush1.bf16.msra.mxu0 %v5146_v15  ;;  %v2935_v15 = vpack.c.bf16 %v1513_v33, %v1512_v14 }
 0x1b0   :  { %2820 = vmatprep.subr.bf16.mxu0 %v5147_v60  ;;  %v1496_v60 = vld [vmem:[%s4891_s3 + $0x140] sm:$0xff] }
 0x1b3   :  { %2822 = vmatpush1.bf16.msra.mxu0 %v5148_v39  ;;  %v1497_v39 = vld [vmem:[%s4891_s3 + $0x148] sm:$0xff] }
 0x1b4   :  { %2824 = vmatprep.subr.bf16.mxu0 %v5149_v29  ;;  %v1514_v29 = vld [vmem:[%s4891_s3 + $0x1d0] sm:$0xff] }
 0x1b7   :  { %2826 = vmatpush1.bf16.msra.mxu0 %v5150_v30  ;;  %v1515_v30 = vld [vmem:[%s4891_s3 + $0x1d8] sm:$0xff] }
 0x1b8   :  { %2828 = vmatprep.subr.bf16.mxu0 %v5151_v7  ;;  %v2937_v7 = vpack.c.bf16 %v1497_v39, %v1496_v60 }
 0x1bb   :  { %2830 = vmatpush1.bf16.msra.mxu0 %v5152_v24  ;;  %v2939_v24 = vpack.c.bf16 %v1515_v30, %v1514_v29 }
 0x1bc   :  { %2832 = vmatprep.subr.bf16.mxu0 %v5153_v35  ;;  %v1498_v35 = vld [vmem:[%s4891_s3 + $0x150] sm:$0xff] }
 0x1bf   :  { %2834 = vmatpush1.bf16.msra.mxu0 %v4120_v48  ;;  %v5154_v48 = vld [vmem:[#allocation4_spill] sm:$0xff] }
 0x1c0   :  { %2836 = vmatprep.subr.bf16.mxu0 %v4123_v6  ;;  %v4650_v6 = vsub.s32 0, %v5154_v48  ;;  %v1795_v29 = vsub.s32 2, %v5154_v48 }
 0x1c3   :  { %2838 = vmatpush1.bf16.msra.mxu0 %v4140_v53  ;;  %v486_v53 = vld [vmem:[%s4892_s2] sm:$0x3] }
 0x1c4   :  { %2840 = vmatprep.subr.bf16.mxu0 %v4143_v41  ;;  %v4657_v41 = vsub.s32 1, %v5154_v48 }
 0x1c6   :  { %1363 = vmatmul.mubr.f32.vlgmr.msra.gmra.mrb[2].mxu0 %v1121_v47  ;;  %v1517_v47 = vld [vmem:[%s4891_s3 + $0x1e8] sm:$0xff] }
 0x1c7   :  { %2842 = vmatpush1.bf16.msra.mxu0 %v4160_v17  ;;  %2064 = vmatprep.mubr.msk.f32.mxu0 %vm451_vm0, %v1150_v32  ;;  %v4665_v17 = vrot.slane %v486_v53, %v4657_v41  ;;  %v1516_v32 = vld [vmem:[%s4891_s3 + $0x1e0] sm:$0xff] }
 0x1c8   :  { %2844 = vmatprep.subr.bf16.mxu0 %v4163_v58  ;;  %v4661_v58 = vrot.slane %v486_v53, %v4650_v6  ;;  %v2941_v53 = vpack.c.bf16 %v1499_v43, %v1498_v35 }
 0x1cb   :  { %2846 = vmatpush1.bf16.msra.mxu0 %v4183_v44  ;;  %v567_v44 = vadd.f32 %v4411_v10, %v4661_v58 }
 0x1cc   :  { %2848 = vmatprep.subr.bf16.mxu0 %v4188_v25  ;;  %v569_v25 = vadd.f32 %v4414_v42, %v4665_v17 }
 0x1cf   :  { %2850 = vmatpush1.bf16.msra.mxu0 %v4205_v31 }
 0x1d0   :  { %2852 = vmatprep.subr.bf16.mxu0 %v4208_v18 }
 0x1d3   :  { %2854 = vmatpush1.bf16.msra.mxu0 %v4225_v0 }
 0x1d4   :  { %2856 = vmatprep.subr.bf16.mxu0 %v4228_v9  ;;  %v1135_v9 = vcombine.high %v4498_v59, %v4498_v59 }
 0x1d7   :  { %2858 = vmatpush1.bf16.msra.mxu0 %v4245_v46  ;;  %v1149_v46 = vrot.slane %v1135_v9, %v5117_v40 }
 0x1d8   :  { %2860 = vmatprep.subr.bf16.mxu0 %v4248_v56  ;;  %v1504_v56 = vld [vmem:[%s4891_s3 + $0x180] sm:$0xff] }
 0x1d9   :  { %v779_v31 = vpop.f32.mrb[0].mxu0 }
 0x1da   :  { %v2964_v18 = vadd.f32 %v779_v31, %v567_v44  ;;  %v781_v0 = vpop.f32.mrb[1].mxu0  ;;  %v2943_v44 = vpack.c.bf16 %v1517_v47, %v1516_v32  ;;  %v1501_v31 = vld [vmem:[%s4891_s3 + $0x168] sm:$0xff] }
 0x1db   :  { %v2966_v54 = vadd.f32 %v781_v0, %v569_v25  ;;  %2862 = vmatpush1.bf16.msra.mxu0 %v4265_v19  ;;  %v1505_v19 = vld [vmem:[%s4891_s3 + $0x188] sm:$0xff]  ;;  %v1500_v25 = vld [vmem:[%s4891_s3 + $0x160] sm:$0xff]  ;;  %v1519_v0 = vld [vmem:[%s4891_s3 + $0x1f8] sm:$0xff] }
 0x1dc   :  { %2864 = vmatprep.subr.bf16.mxu0 %v4268_v28  ;;  %v2919_v28 = vpack.c.bf16 %v1505_v19, %v1504_v56  ;;  %v1440_v2 = vmax.f32 %v2964_v18, 0.0  ;;  %v1518_v18 = vld [vmem:[%s4891_s3 + $0x1f0] sm:$0xff]  ;;  %v1503_v56 = vld [vmem:[%s4891_s3 + $0x178] sm:$0xff] }
 0x1dd   :  { %v2947_v9 = vpack.c.bf16 %v1519_v0, %v1518_v18 }
 0x1de   :  { %2920 = vmatprep.subr.bf16.mxu1 %v2919_v28  ;;  %v3014_v28 = vmov 0.0|0.0  }
 0x1df   :  { %2866 = vmatpush1.bf16.msra.mxu0 %v4285_v13 }
 0x1e0   :  { %2868 = vmatprep.subr.bf16.mxu0 %v4288_v37 }
 0x1e3   :  { %2870 = vmatpush1.bf16.msra.mxu0 %v4305_v3 }
 0x1e4   :  { %2872 = vmatprep.subr.bf16.mxu0 %v4308_v45 }
 0x1e7   :  { %2874 = vmatpush1.bf16.msra.mxu0 %v4325_v12 }
 0x1e8   :  { %2876 = vmatprep.subr.bf16.mxu0 %v4328_v20 }
 0x1eb   :  { %2878 = vmatpush1.bf16.msra.mxu0 %v4345_v16  ;;  %v1488_v16 = vld [vmem:[%s4891_s3 + $0x100] sm:$0xff] }
 0x1ec   :  { %2880 = vmatprep.subr.bf16.mxu0 %v4348_v36  ;;  %v1489_v36 = vld [vmem:[%s4891_s3 + $0x108] sm:$0xff] }
 0x1ed   :  { %v2921_v42 = vpack.c.bf16 %v1489_v36, %v1488_v16 }
 0x1ef   :  { %2882 = vmatpush1.bf16.msra.mxu0 %v4365_v49  ;;  %v1506_v49 = vld [vmem:[%s4891_s3 + $0x190] sm:$0xff] }
 0x1f0   :  { %2884 = vmatprep.subr.bf16.mxu0 %v4368_v63  ;;  %v1507_v63 = vld [vmem:[%s4891_s3 + $0x198] sm:$0xff] }
 0x1f1   :  { %v2923_v27 = vpack.c.bf16 %v1507_v63, %v1506_v49  ;;  %v1522_v49 = vld [vmem:[%s4891_s3 + $0x210] sm:$0xff]  ;;  %v1523_v63 = vld [vmem:[%s4891_s3 + $0x218] sm:$0xff] }
 0x1f3   :  { %2886 = vmatpush1.bf16.msra.mxu0 %v4379_v11  ;;  %v1441_v11 = vmax.f32 %v2966_v54, 0.0  ;;  %v2945_v54 = vpack.c.bf16 %v1501_v31, %v1500_v25 }
 0x1f6   :  { %1434 = vmatmul.mubr.f32.vlgmr.msra.gmra.mrb[2].mxu0 %v1149_v46  ;;  %v1502_v46 = vld [vmem:[%s4891_s3 + $0x170] sm:$0xff] }
 0x1f7   :  { %v2949_v19 = vpack.c.bf16 %v1503_v56, %v1502_v46 }
 0x207   :  { %v1108_v13 = vpop.f32.mrb[2].mxu1 }
 0x208   :  { %v2967_v37 = vadd.f32 %v1108_v13, %v4661_v58  ;;  %v1110_v3 = vpop.f32.mrb[3].mxu1 }
 0x209   :  { %v2968_v45 = vadd.f32 %v1110_v3, %v4665_v17  ;;  %v1521_v3 = vld [vmem:[%s4891_s3 + $0x208] sm:$0xff] }
 0x20a   :  { %v1442_v12 = vmax.f32 %v2967_v37, 0.0  ;;  %v1520_v37 = vld [vmem:[%s4891_s3 + $0x200] sm:$0xff] }
 0x20b   :  { %v1443_v20 = vmax.f32 %v2968_v45, 0.0  ;;  %v2952_v36 = vpack.c.bf16 %v1521_v3, %v1520_v37 }
 0x20c   :  { %1448 = vrot.lane.b32.xlu0 %v1442_v12, %s3013_s28 }
 0x20d   :  { %1450 = vrot.lane.b32.xlu1 %v1443_v20, %s3013_s28 }
 0x27e   :  { %v4711_v10 = vpop.permute.xlu0 %1448 }
 0x27f   :  { %v1455_v59 = vsel %vm451_vm0, %v1441_v11, %v4711_v10  ;;  %v1451_v20 = vpop.permute.xlu1 %1450 }
 0x280   :  { %1602 = vmatprep.mubr.f32.mxu1 %v1455_v59  ;;  %v1452_v11 = vsel %vm451_vm0, %v4711_v10, %v1451_v20  ;;  %v1525_v59 = vld [vmem:[%s4891_s3 + $0x228] sm:$0xff]  ;;  %v1526_v10 = vld [vmem:[%s4891_s3 + $0x230] sm:$0xff] }
 0x281   :  { %1603 = vmatmul.mubr.f32.vlgmr.msra.gmra.mrb[4].mxu1 %v1440_v2  ;;  %v1524_v2 = vld [vmem:[%s4891_s3 + $0x220] sm:$0xff]  ;;  %v2961_v22 = vpack.c.bf16 %v1527_v4, %v1526_v10  ;;  %v5155_v10 = vld [vmem:[#allocation12_spill] sm:$0xff] }
 0x282   :  { %2922 = vmatpush3.bf16.msra.mxu1 %v2921_v42  ;;  %v2955_v42 = vpack.c.bf16 %v1523_v63, %v1522_v49 }
 0x283   :  { %2924 = vmatprep.subr.bf16.mxu1 %v2923_v27  ;;  %v2958_v27 = vpack.c.bf16 %v1525_v59, %v1524_v2 }
 0x286   :  { %2926 = vmatpush3.bf16.msra.mxu1 %v2925_v62 }
 0x287   :  { %2928 = vmatprep.subr.bf16.mxu1 %v2927_v1 }
 0x28a   :  { %2930 = vmatpush3.bf16.msra.mxu1 %v2929_v8 }
 0x28b   :  { %2932 = vmatprep.subr.bf16.mxu1 %v2931_v57 }
 0x28e   :  { %2934 = vmatpush3.bf16.msra.mxu1 %v2933_v50 }
 0x28f   :  { %2936 = vmatprep.subr.bf16.mxu1 %v2935_v15 }
 0x292   :  { %2938 = vmatpush3.bf16.msra.mxu1 %v2937_v7 }
 0x293   :  { %2940 = vmatprep.subr.bf16.mxu1 %v2939_v24 }
 0x296   :  { %2942 = vmatpush3.bf16.msra.mxu1 %v2941_v53 }
 0x297   :  { %2944 = vmatprep.subr.bf16.mxu1 %v2943_v44 }
 0x29a   :  { %2946 = vmatpush3.bf16.msra.mxu1 %v2945_v54 }
 0x29b   :  { %2948 = vmatprep.subr.bf16.mxu1 %v2947_v9 }
 0x29e   :  { %2950 = vmatpush3.bf16.msra.mxu1 %v2949_v19 }
 0x29f   :  { %2951 = vmatprep.subr.bf16.mxu1 %v3014_v28 }
 0x2c9   :  { %v1435_v13 = vpop.f32.mrb[2].mxu0 }
 0x2ca   :  { %v2969_v45 = vadd.f32 %v1435_v13, %v4661_v58  ;;  %v1437_v12 = vpop.f32.mrb[3].mxu0  ;;  %v3016_v58 = vmov 0.0  }
 0x2cb   :  { %v2970_v38 = vadd.f32 %v1437_v12, %v4665_v17 }
 0x2cc   :  { %v1444_v16 = vmax.f32 %v2969_v45, 0.0 }
 0x2cd   :  { %v1445_v5 = vmax.f32 %v2970_v38, 0.0 }
 0x2ce   :  { %1672 = vmatprep.mubr.f32.mxu1 %v1444_v16 }
 0x2cf   :  { %1673 = vmatmul.mubr.f32.vlgmr.msra.gmra.mrb[6].mxu1 %v1452_v11 }
 0x2d0   :  { %2953 = vmatpush3.bf16.msra.mxu1 %v2952_v36  ;;  %2164 = vmatprep.mubr.msk.f32.mxu1 %vm3015_vm1, %v3016_v58 }
 0x2d1   :  { %2954 = vmatprep.subr.bf16.mxu1 %v3014_v28 }
 0x2d4   :  { %2956 = vmatpush3.bf16.msra.mxu1 %v2955_v42 }
 0x2d5   :  { %2957 = vmatprep.subr.bf16.mxu1 %v3014_v28 }
 0x2d8   :  { %2959 = vmatpush3.bf16.msra.mxu1 %v2958_v27 }
 0x2d9   :  { %2960 = vmatprep.subr.bf16.mxu1 %v3014_v28 }
 0x2dc   :  { %2962 = vmatpush3.bf16.msra.mxu1 %v2961_v22  ;;  %v5156_v22 = vld [vmem:[#allocation11_spill] sm:$0xff] }
 0x2df   :  { %2165 = vmatmul.mubr.msk.f32.vlgmr.msra.gmra.mrb[8].mxu1 %vm451_vm0, %v1445_v5 }
 0x354   :  { %v2101_v62 = vpop.f32.mrb[4].mxu1 }
 0x355   :  { %v2102_v1 = vpop.f32.mrb[5].mxu1 }
 0x356   :  { %v2103_v52 = vadd.f32 %v2102_v1, %v2101_v62 }
 0x358   :  { %v1605_v8 = vadd.f32 %v2103_v52, %v2065_v34  ;;  %v5157_v52 = vld [vmem:[#allocation13_spill] sm:$0xff] }
 0x3a2   :  { %v2136_v55 = vpop.f32.mrb[6].mxu1 }
 0x3a3   :  { %v2137_v21 = vpop.f32.mrb[7].mxu1 }
 0x3a4   :  { %v2138_v57 = vadd.f32 %v2137_v21, %v2136_v55  ;;  %v5158_v55 = vld [vmem:[#allocation15_spill] sm:$0xff] }
 0x3a6   :  { %v1675_v23 = vadd.f32 %v2138_v57, %v1605_v8  ;;  %v5159_v8 = vld [vmem:[#allocation57_spill] sm:$0xff] }
 0x3b2   :  { %v1744_v26 = vpop.f32.mrb[8].mxu1 }
 0x3b3   :  { %v1745_v14 = vadd.f32 %v1744_v26, %v1675_v23  ;;  %v2166_v17 = vpop.f32.mrb[9].mxu1  ;;  %v5160_v23 = vld [vmem:[#allocation14_spill] sm:$0xff] }
 0x3b4   :  { %v5161_v17 = vld [vmem:[#allocation16_spill] sm:$0xff] }
 0x3b5   :  { %1749 = vrot.lane.b32.xlu0 %v1745_v14, %s3013_s28  ;;  %v1768_v60 = vrot.slane %v1745_v14, %v5117_v40 }
 0x427   :  { %v1750_v33 = vpop.permute.xlu0 %1749 }
 0x428   :  { %v1752_v50 = vsel %vm451_vm0, %v1745_v14, %v1750_v33 }
 0x429   :  { %v1754_v15 = vcombine.low %v1752_v50, %v1752_v50  ;;  %v5162_v50 = vld [vmem:[#allocation58_spill] sm:$0xff] }
 0x42b   :  { %v1761_v39 = vrot.slane %v1754_v15, %v5117_v40 }
 0x42d   :  { %v1769_v30 = vcombine.low %v1761_v39, %v1768_v60  ;;  %v1770_v7 = vcombine.high %v1761_v39, %v1768_v60 }
 0x42f   :  { %v1777_v24 = vrot.slane %v1769_v30, %v5117_v40  ;;  %v1784_v35 = vrot.slane %v1770_v7, %v5117_v40 }
 0x431   :  { %v1788_v43 = vrot.slane %v1777_v24, %v4650_v6  ;;  %v1792_v32 = vrot.slane %v1777_v24, %v4657_v41  ;;  %v1796_v47 = vrot.slane %v1777_v24, %v1795_v29  ;;  %v1800_v53 = vrot.slane %v1784_v35, %v4650_v6 }
 0x432   :  { %v1804_v44 = vrot.slane %v1784_v35, %v4657_v41  ;;  %v1808_v25 = vrot.slane %v1784_v35, %v1795_v29 }
 0x433   :  { %v1809_v31 = vcombine.low %v1788_v43, %v1792_v32  ;;  %v1810_v18 = vcombine.high %v1788_v43, %v1792_v32  ;;  %v1811_v0 = vcombine.high %v1796_v47, %v1796_v47  ;;  %v1832_v19 = vrot.slane %v1796_v47, %v5117_v40 }
 0x434   :  { %v1866_v48 = vcombine.low %v1800_v53, %v1804_v44  ;;  %v1867_v54 = vcombine.high %v1800_v53, %v1804_v44  ;;  %v1868_v9 = vcombine.high %v1808_v25, %v1808_v25  ;;  %v1889_v41 = vrot.slane %v1808_v25, %v5117_v40 }
 0x435   :  { %v1818_v46 = vrot.slane %v1809_v31, %v5117_v40  ;;  %v1825_v56 = vrot.slane %v1810_v18, %v5117_v40  ;;  %v1839_v28 = vrot.slane %v1811_v0, %v5117_v40 }
 0x436   :  { %v1875_v13 = vrot.slane %v1866_v48, %v5117_v40  ;;  %v1882_v6 = vrot.slane %v1867_v54, %v5117_v40  ;;  %v1896_v37 = vrot.slane %v1868_v9, %v5117_v40 }
 0x437   :  { %v1840_v3 = vcombine.low %v1818_v46, %v1832_v19  ;;  %v1841_v45 = vcombine.high %v1818_v46, %v1832_v19  ;;  %v1842_v12 = vcombine.low %v1825_v56, %v1839_v28 }
 0x438   :  { %v1897_v20 = vcombine.low %v1875_v13, %v1889_v41  ;;  %v1898_v16 = vcombine.high %v1875_v13, %v1889_v41  ;;  %v1899_v36 = vcombine.low %v1882_v6, %v1896_v37 }
 0x439   :  { %v1849_v49 = vrot.slane %v1840_v3, %v5117_v40  ;;  %v1856_v63 = vrot.slane %v1842_v12, %v5117_v40  ;;  %v1863_v11 = vrot.slane %v1841_v45, %v5117_v40 }
 0x43a   :  { %v1906_v42 = vrot.slane %v1897_v20, %v5117_v40  ;;  %v1913_v58 = vrot.slane %v1899_v36, %v5117_v40  ;;  %v1920_v2 = vrot.slane %v1898_v16, %v5117_v40 }
 0x43b   :  { %v1864_v59 = vcombine.high %v1849_v49, %v1849_v49  ;;  %v1865_v27 = vcombine.high %v1863_v11, %v1863_v11  ;;  %v1933_v4 = vadd.f32 %v1849_v49, %v5155_v10  ;;  %v1934_v38 = vadd.f32 %v1863_v11, %v5156_v22 }
 0x43c   :  { %v1921_v5 = vcombine.high %v1906_v42, %v1906_v42  ;;  %v1922_v62 = vcombine.high %v1920_v2, %v1920_v2  ;;  %v1937_v1 = vadd.f32 %v1856_v63, %v5120_v61  ;;  %v1938_v34 = vadd.f32 %v1906_v42, %v5157_v52 }
 0x43d   :  { %v1935_v21 = vadd.f32 %v1864_v59, %v5158_v55  ;;  %v1936_v57 = vadd.f32 %v1865_v27, %v5159_v8  ;;  %v1939_v26 = vadd.f32 %v1920_v2, %v5160_v23  ;;  %v1942_v14 = vadd.f32 %v1913_v58, %v4487_v51 }
 0x43e   :  { %v1940_v33 = vadd.f32 %v1921_v5, %v5161_v17  ;;  %v1941_v15 = vadd.f32 %v1922_v62, %v5162_v50  ;;  %v1953_v60 = vcombine.low %v1933_v4, %v1934_v38  ;;  %v1955_v39 = vcombine.low %v1937_v1, %v1938_v34 }
 0x43f   :  { %v1954_v29 = vcombine.low %v1935_v21, %v1936_v57 }
 0x440   :  { %v1956_v30 = vcombine.low %v1939_v26, %v1940_v33  ;;  %v2020_v7 = vcombine.low %v1941_v15, %v1942_v14  ;;  %v1963_v61 = vrot.slane %v1953_v60, %v5117_v40  ;;  %v1977_v35 = vrot.slane %v1955_v39, %v5117_v40 }
 0x441   :  { %v1970_v24 = vrot.slane %v1954_v29, %v5117_v40 }
 0x442   :  { %v1984_v43 = vrot.slane %v1956_v30, %v5117_v40  ;;  %v2027_v32 = vrot.slane %v2020_v7, %v5117_v40 }
 0x443   :  { %v1985_v51 = vcombine.low %v1963_v61, %v1970_v24  ;;  %v1986_v47 = vcombine.high %v1963_v61, %v1970_v24 }
 0x444   :  { %v1987_v53 = vcombine.low %v1977_v35, %v1984_v43  ;;  %v1988_v44 = vcombine.high %v1977_v35, %v1984_v43  ;;  %v2028_v25 = vcombine.high %v2027_v32, %v2027_v32  ;;  %v2035_v31 = vrot.slane %v2027_v32, %v5117_v40  ;;  %2067 = vst.sshfl [vmem:[%s4894_s5 + $0x18] sm:$0x5 pattern:$0x73625140] %v2027_v32 }
 0x445   :  { %v1995_v18 = vrot.slane %v1985_v51, %v5117_v40  ;;  %v2002_v0 = vrot.slane %v1986_v47, %v5117_v40 }
 0x446   :  { %v2009_v48 = vrot.slane %v1987_v53, %v5117_v40  ;;  %v2016_v54 = vrot.slane %v1988_v44, %v5117_v40  ;;  %v2043_v9 = vcombine.high %v2035_v31, %v2035_v31  ;;  %2068 = vst.sshfl [vmem:[%s4894_s5 + $0x20] sm:$0x5 pattern:$0x73625140] %v2028_v25 }
 0x448   :  { %v2017_v46 = vcombine.low %v1995_v18, %v2009_v48  ;;  %v2018_v56 = vcombine.high %v1995_v18, %v2009_v48  ;;  %v2019_v19 = vcombine.low %v2002_v0, %v2016_v54  ;;  %2056 = vst.msk [vmem:[%s4894_s5 + $0x28] sm:$0x3] %vm2055_vm2, %v2043_v9 }
 0x44a   :  { %2050 = vst [vmem:[%s4894_s5] sm:$0xff] %v2017_v46  ;;  %2051 = vst [vmem:[%s4894_s5 + $0x8] sm:$0xff] %v2019_v19 }
 0x44b   :  { %2052 = vst.msk [vmem:[%s4894_s5 + $0x10] sm:$0xff] %vm451_vm0, %v2018_v56 }

</bundles_post_ra>
